<compile_context>
chip_gen: v5e
topology: v5e:2x2
jax: 0.10.0
libtpu: 0.0.40
codegen_flags: <defaults>
</compile_context>

<pallas_src>
import functools

import jax
import jax.numpy as jnp
from jax.experimental import pallas as pl
from jax.experimental.pallas import tpu as pltpu


# ----------------------------- Pallas kernel ------------------------------- #
#   w_ref : (Cout, K)   BN scale already folded into the weight rows
#   x_ref : (K, tm)     column tile of the im2col patches (M on the lane axis)
#   b_ref : (Cout, 1)   folded conv+BN bias, broadcast over lanes
#   o_ref : (Cout, tm)  lane-dense output tile

def _matmul_bias_kernel(w_ref, x_ref, b_ref, o_ref, *, relu):
    y = jnp.dot(w_ref[...], x_ref[...], preferred_element_type=jnp.float32)
    y = y + b_ref[...]
    if relu:
        y = jnp.maximum(y, 0.0)
    o_ref[...] = y.astype(o_ref.dtype)


def fused_matmul_t(w, xT, bias, *, relu, tm):
    """outT = act(w @ xT + bias).  w:(Cout,K)  xT:(K,M)  bias:(Cout,1) -> (Cout,M).

    NOTE(ragged tail): the last grid step may read out-of-bounds columns of xT;
    their results are garbage but every output column depends only on its own
    input column and OOB output columns are dropped by Pallas, so this is safe.
    Do NOT add any cross-column op (reduction over M / max over the tile) here
    without masking the tail first.
    """
    Cout, K = w.shape
    Kx, M = xT.shape
    assert K == Kx
    tm = min(tm, M)                       # small-M case: single full-extent block
    grid = (int(pl.cdiv(M, tm)),)
    return pl.pallas_call(
        functools.partial(_matmul_bias_kernel, relu=relu),
        out_shape=jax.ShapeDtypeStruct((Cout, M), jnp.float32),
        grid=grid,
        in_specs=[
            pl.BlockSpec((Cout, K), lambda i: (0, 0)),   # full scale-folded weight
            pl.BlockSpec((K, tm), lambda i: (0, i)),     # lane tile of patches^T
            pl.BlockSpec((Cout, 1), lambda i: (0, 0)),   # folded bias (column vector)
        ],
        out_specs=pl.BlockSpec((Cout, tm), lambda i: (0, i)),
        compiler_params=pltpu.CompilerParams(dimension_semantics=("parallel",)),
    )(w, xT, bias)


# ------------------------------- im2col glue -------------------------------- #
# Runs inside the jitted wrapper -> XLA fuses the pad / strided slices / stack.

def extract_patches_t(x_cnhw, kh, kw, stride, pad):
    """(C, N, H, W) -> (C*kh*kw, N*OH*OW).  K order = (C, kh, kw) to match
    PyTorch's weight.reshape(Cout, -1); M order = (N, OH, OW)."""
    C, N, H, W = x_cnhw.shape
    xp = jnp.pad(x_cnhw, ((0, 0), (0, 0), (pad, pad), (pad, pad)))
    OH = (H + 2 * pad - kh) // stride + 1
    OW = (W + 2 * pad - kw) // stride + 1
    cols = [xp[:, :, i:i + stride * OH:stride, j:j + stride * OW:stride]
            for i in range(kh) for j in range(kw)]       # each (C, N, OH, OW)
    p = jnp.stack(cols, axis=1)                          # (C, kh*kw, N, OH, OW)
    return p.reshape(C * kh * kw, N * OH * OW), OH, OW


def fold_bn_into_weight(w_oihw, conv_b, gamma, beta, mean, var, eps=1e-5):
    """Fold inference-mode BatchNorm into (weight, bias):  s = g/sqrt(v+eps)."""
    Cout = w_oihw.shape[0]
    s = gamma / jnp.sqrt(var + eps)                      # (Cout,)
    w_mat = w_oihw.reshape(Cout, -1) * s[:, None]        # (Cout, Cin*kh*kw)
    b = ((conv_b - mean) * s + beta)[:, None]            # (Cout, 1)
    return w_mat, b


def _pad_rows_to_multiple(a, mult=8):
    """Zero-pad the leading (Cout / sublane) dim up to a multiple of `mult`."""
    r = (-a.shape[0]) % mult
    if r == 0:
        return a
    return jnp.concatenate([a, jnp.zeros((r,) + a.shape[1:], a.dtype)], axis=0)


# ------------------------------ Encoder forward ----------------------------- #

def _encoder_forward_impl(x, params, *, tm1, tm2):
    """x: (B, T, C, H, W) float32  ->  (B, T, s_dim) float32."""
    B, T, C, H, W = x.shape
    N = B * T
    x_cnhw = x.reshape(N, C, H, W).transpose(1, 0, 2, 3)          # (C, N, H, W)

    # --- conv1 (k=3, s=2, p=1) + BN1 + ReLU --- (Cout zero-padded to mult of 8)
    w1, b1 = fold_bn_into_weight(params["conv1_w"], params["conv1_b"],
                                 params["bn1_g"], params["bn1_b"],
                                 params["bn1_m"], params["bn1_v"])
    c1 = w1.shape[0]
    w1p, b1p = _pad_rows_to_multiple(w1), _pad_rows_to_multiple(b1)
    p1, OH1, OW1 = extract_patches_t(x_cnhw, 3, 3, 2, 1)          # (C*9, N*OH1*OW1)
    y1 = fused_matmul_t(w1p, p1, b1p, relu=True, tm=tm1)[:c1]     # drop pad rows
    y1 = y1.reshape(c1, N, OH1, OW1)                              # channel-major

    # --- conv2 (k=5, s=2, p=2) + BN2 + ReLU ---
    w2, b2 = fold_bn_into_weight(params["conv2_w"], params["conv2_b"],
                                 params["bn2_g"], params["bn2_b"],
                                 params["bn2_m"], params["bn2_v"])
    c2 = w2.shape[0]
    w2p, b2p = _pad_rows_to_multiple(w2), _pad_rows_to_multiple(b2)
    p2, OH2, OW2 = extract_patches_t(y1, 5, 5, 2, 2)              # (c1*25, N*OH2*OW2)
    y2 = fused_matmul_t(w2p, p2, b2p, relu=True, tm=tm2)[:c2]     # (c2, N*OH2*OW2)

    # --- FC in XLA (review: no grid=1 / M=6 pallas_call, no flatten transpose) ---
    s_dim = params["fc_w"].shape[0]
    y2r = y2.reshape(c2, N, OH2 * OW2)                            # (c2, N, P)
    fcw = params["fc_w"].reshape(s_dim, c2, OH2 * OW2)            # PyTorch NCHW order
    out = jnp.einsum("scp,cnp->ns", fcw, y2r,
                     precision=jax.lax.Precision.HIGHEST) + params["fc_b"][None, :]
    return out.reshape(B, T, s_dim)


encoder_forward = jax.jit(_encoder_forward_impl, static_argnames=("tm1", "tm2"))


def pick_tiles():
    """Per-generation lane-tile sizes (multiples of 128).

    Multi-TensorCore parts (v7x): >=4 balanced grid steps per conv stage so the
    grid shards evenly over both cores with pipelining intact.
    Single-TC parts (v5e/v6e): 2 large steps per stage to minimise per-step cost.
    """
    try:
        kind = jax.devices()[0].device_kind.lower()
    except Exception:
        kind = ""
    multi_tc = ("v7" in kind) or ("7x" in kind)
    if multi_tc:
        return 1664, 512     # conv1: 1664x3+1542 (4 steps); conv2: 512x3+198 (4 steps)
    return 3328, 896         # conv1: 3328+3206   (2 steps); conv2: 896+838    (2 steps)


# --------------------- Independent plain-JAX reference ---------------------- #

def encoder_reference(x, params, eps=1e-5):
    B, T, C, H, W = x.shape
    N = B * T
    xi = x.reshape(N, C, H, W)

    def conv_bn_relu(h, w, b, g, beta, m, v, stride, pad):
        y = jax.lax.conv_general_dilated(
            h, w, window_strides=(stride, stride),
            padding=[(pad, pad), (pad, pad)],
            dimension_numbers=("NCHW", "OIHW", "NCHW"),
            precision=jax.lax.Precision.HIGHEST)
        y = y + b[None, :, None, None]
        y = ((y - m[None, :, None, None]) * (g / jnp.sqrt(v + eps))[None, :, None, None]
             + beta[None, :, None, None])
        return jnp.maximum(y, 0.0)

    y1 = conv_bn_relu(xi, params["conv1_w"], params["conv1_b"], params["bn1_g"],
                      params["bn1_b"], params["bn1_m"], params["bn1_v"], 2, 1)
    y2 = conv_bn_relu(y1, params["conv2_w"], params["conv2_b"], params["bn2_g"],
                      params["bn2_b"], params["bn2_m"], params["bn2_v"], 2, 2)
    flat = y2.reshape(N, -1)
    out = jnp.matmul(flat, params["fc_w"].T,
                     precision=jax.lax.Precision.HIGHEST) + params["fc_b"]
    return out.reshape(B, T, -1)


# ---------------------------------- main ------------------------------------ #

if __name__ == "__main__":
    B, T = 2, 3
    C, H, W = 2, 65, 65                    # fixed by the PyTorch module
    cnn_dim, s_dim = 4, 32
    H1, W1 = (H - 1) // 2 + 1, (W - 1) // 2 + 1      # 33, 33
    H2, W2 = (H1 - 1) // 2 + 1, (W1 - 1) // 2 + 1    # 17, 17
    fc_in = H2 * W2 * cnn_dim * 2                    # 2312

    ks = jax.random.split(jax.random.PRNGKey(0), 15)
    params = {
        "conv1_w": 0.1 * jax.random.normal(ks[0], (cnn_dim, C, 3, 3), jnp.float32),
        "conv1_b": 0.1 * jax.random.normal(ks[1], (cnn_dim,), jnp.float32),
        "bn1_g":   1.0 + 0.1 * jax.random.normal(ks[2], (cnn_dim,), jnp.float32),
        "bn1_b":   0.1 * jax.random.normal(ks[3], (cnn_dim,), jnp.float32),
        "bn1_m":   0.1 * jax.random.normal(ks[4], (cnn_dim,), jnp.float32),
        "bn1_v":   jnp.abs(1.0 + 0.1 * jax.random.normal(ks[5], (cnn_dim,), jnp.float32)),
        "conv2_w": 0.1 * jax.random.normal(ks[6], (2 * cnn_dim, cnn_dim, 5, 5), jnp.float32),
        "conv2_b": 0.1 * jax.random.normal(ks[7], (2 * cnn_dim,), jnp.float32),
        "bn2_g":   1.0 + 0.1 * jax.random.normal(ks[8], (2 * cnn_dim,), jnp.float32),
        "bn2_b":   0.1 * jax.random.normal(ks[9], (2 * cnn_dim,), jnp.float32),
        "bn2_m":   0.1 * jax.random.normal(ks[10], (2 * cnn_dim,), jnp.float32),
        "bn2_v":   jnp.abs(1.0 + 0.1 * jax.random.normal(ks[11], (2 * cnn_dim,), jnp.float32)),
        "fc_w":    0.02 * jax.random.normal(ks[12], (s_dim, fc_in), jnp.float32),
        "fc_b":    0.02 * jax.random.normal(ks[13], (s_dim,), jnp.float32),
    }

    x = jax.random.normal(ks[14], (B, T, C, H, W), jnp.float32)

    tm1, tm2 = pick_tiles()
    out = jax.block_until_ready(encoder_forward(x, params, tm1=tm1, tm2=tm2))
    assert out.shape == (B, T, s_dim), out.shape

    ref = jax.block_until_ready(encoder_reference(x, params))
    max_err = float(jnp.max(jnp.abs(out - ref)))
    assert jnp.allclose(out, ref, atol=1e-3, rtol=1e-3), max_err

    print("KERNEL_OK")
</pallas_src>

<mosaic_0001>
module attributes {stable_mosaic.version = 11 : i64} {
  func.func @_matmul_bias_kernel(%arg0: i32, %arg1: memref<8x18xf32, #tpu.memory_space<vmem>>, %arg2: memref<18x3328xf32, #tpu.memory_space<vmem>>, %arg3: memref<8x1xf32, #tpu.memory_space<vmem>>, %arg4: memref<8x3328xf32, #tpu.memory_space<vmem>>) attributes {dimension_semantics = [#tpu.dimension_semantics<parallel>], iteration_bounds = array<i64: 2>, scalar_prefetch = 0 : i64, scratch_operands = 0 : i64, tpu.core_type = #tpu.core_type<tc>, window_params = [{pipeline_mode = #tpu.pipeline_mode<synchronous>, transform_indices = @transform_0, window_bounds = array<i64: 8, 18>}, {transform_indices = @transform_1, window_bounds = array<i64: 18, 3328>}, {pipeline_mode = #tpu.pipeline_mode<synchronous>, transform_indices = @transform_2, window_bounds = array<i64: 8, 1>}, {transform_indices = @transform_3, window_bounds = array<i64: 8, 3328>}]} {
    %c0 = arith.constant 0 : index
    %c0_0 = arith.constant 0 : index
    %0 = vector.load %arg1[%c0, %c0_0] : memref<8x18xf32, #tpu.memory_space<vmem>>, vector<8x18xf32>
    %c0_1 = arith.constant 0 : index
    %c0_2 = arith.constant 0 : index
    %1 = vector.load %arg2[%c0_1, %c0_2] : memref<18x3328xf32, #tpu.memory_space<vmem>>, vector<18x3328xf32>
    %cst = arith.constant dense<0.000000e+00> : vector<8x3328xf32>
    %2 = tpu.matmul %0, %1, %cst {dimension_numbers = #tpu.dot_dimension_numbers<[1], [0], [0], [1], [0, 0, 1, 1], [], []>} : vector<8x18xf32>, vector<18x3328xf32>, vector<8x3328xf32> -> vector<8x3328xf32>
    %c0_3 = arith.constant 0 : index
    %c0_4 = arith.constant 0 : index
    %3 = vector.load %arg3[%c0_3, %c0_4] : memref<8x1xf32, #tpu.memory_space<vmem>>, vector<8x1xf32>
    %4 = vector.broadcast %3 : vector<8x1xf32> to vector<8x3328xf32>
    %5 = arith.addf %2, %4 : vector<8x3328xf32>
    %cst_5 = arith.constant 0.000000e+00 : f32
    %6 = vector.broadcast %cst_5 : f32 to vector<8x3328xf32>
    %7 = arith.maximumf %5, %6 : vector<8x3328xf32>
    %c0_6 = arith.constant 0 : index
    %c0_7 = arith.constant 0 : index
    %8 = vector.load %arg4[%c0_6, %c0_7] : memref<8x3328xf32, #tpu.memory_space<vmem>>, vector<8x3328xf32>
    tpu.vector_store %arg4[%c0_6, %c0_7], %7 {strides = array<i32>} : memref<8x3328xf32, #tpu.memory_space<vmem>>, vector<8x3328xf32>,
    return
  }
  func.func @transform_0(%arg0: i32) -> (i32, i32) {
    %c0_i32 = arith.constant 0 : i32
    %c0_i32_0 = arith.constant 0 : i32
    %c0_i32_1 = arith.constant 0 : i32
    return %c0_i32, %c0_i32_0 : i32, i32
  }
  func.func @transform_1(%arg0: i32) -> (i32, i32) {
    %c0_i32 = arith.constant 0 : i32
    %c0_i32_0 = arith.constant 0 : i32
    return %c0_i32, %arg0 : i32, i32
  }
  func.func @transform_2(%arg0: i32) -> (i32, i32) {
    %c0_i32 = arith.constant 0 : i32
    %c0_i32_0 = arith.constant 0 : i32
    %c0_i32_1 = arith.constant 0 : i32
    return %c0_i32, %c0_i32_0 : i32, i32
  }
  func.func @transform_3(%arg0: i32) -> (i32, i32) {
    %c0_i32 = arith.constant 0 : i32
    %c0_i32_0 = arith.constant 0 : i32
    return %c0_i32, %arg0 : i32, i32
  }
}

module attributes {stable_mosaic.version = 11 : i64} {
  func.func @_matmul_bias_kernel(%arg0: i32, %arg1: memref<8x100xf32, #tpu.memory_space<vmem>>, %arg2: memref<100x896xf32, #tpu.memory_space<vmem>>, %arg3: memref<8x1xf32, #tpu.memory_space<vmem>>, %arg4: memref<8x896xf32, #tpu.memory_space<vmem>>) attributes {dimension_semantics = [#tpu.dimension_semantics<parallel>], iteration_bounds = array<i64: 2>, scalar_prefetch = 0 : i64, scratch_operands = 0 : i64, tpu.core_type = #tpu.core_type<tc>, window_params = [{pipeline_mode = #tpu.pipeline_mode<synchronous>, transform_indices = @transform_0, window_bounds = array<i64: 8, 100>}, {transform_indices = @transform_1, window_bounds = array<i64: 100, 896>}, {pipeline_mode = #tpu.pipeline_mode<synchronous>, transform_indices = @transform_2, window_bounds = array<i64: 8, 1>}, {transform_indices = @transform_3, window_bounds = array<i64: 8, 896>}]} {
    %c0 = arith.constant 0 : index
    %c0_0 = arith.constant 0 : index
    %0 = vector.load %arg1[%c0, %c0_0] : memref<8x100xf32, #tpu.memory_space<vmem>>, vector<8x100xf32>
    %c0_1 = arith.constant 0 : index
    %c0_2 = arith.constant 0 : index
    %1 = vector.load %arg2[%c0_1, %c0_2] : memref<100x896xf32, #tpu.memory_space<vmem>>, vector<100x896xf32>
    %cst = arith.constant dense<0.000000e+00> : vector<8x896xf32>
    %2 = tpu.matmul %0, %1, %cst {dimension_numbers = #tpu.dot_dimension_numbers<[1], [0], [0], [1], [0, 0, 1, 1], [], []>} : vector<8x100xf32>, vector<100x896xf32>, vector<8x896xf32> -> vector<8x896xf32>
    %c0_3 = arith.constant 0 : index
    %c0_4 = arith.constant 0 : index
    %3 = vector.load %arg3[%c0_3, %c0_4] : memref<8x1xf32, #tpu.memory_space<vmem>>, vector<8x1xf32>
    %4 = vector.broadcast %3 : vector<8x1xf32> to vector<8x896xf32>
    %5 = arith.addf %2, %4 : vector<8x896xf32>
    %cst_5 = arith.constant 0.000000e+00 : f32
    %6 = vector.broadcast %cst_5 : f32 to vector<8x896xf32>
    %7 = arith.maximumf %5, %6 : vector<8x896xf32>
    %c0_6 = arith.constant 0 : index
    %c0_7 = arith.constant 0 : index
    %8 = vector.load %arg4[%c0_6, %c0_7] : memref<8x896xf32, #tpu.memory_space<vmem>>, vector<8x896xf32>
    tpu.vector_store %arg4[%c0_6, %c0_7], %7 {strides = array<i32>} : memref<8x896xf32, #tpu.memory_space<vmem>>, vector<8x896xf32>,
    return
  }
  func.func @transform_0(%arg0: i32) -> (i32, i32) {
    %c0_i32 = arith.constant 0 : i32
    %c0_i32_0 = arith.constant 0 : i32
    %c0_i32_1 = arith.constant 0 : i32
    return %c0_i32, %c0_i32_0 : i32, i32
  }
  func.func @transform_1(%arg0: i32) -> (i32, i32) {
    %c0_i32 = arith.constant 0 : i32
    %c0_i32_0 = arith.constant 0 : i32
    return %c0_i32, %arg0 : i32, i32
  }
  func.func @transform_2(%arg0: i32) -> (i32, i32) {
    %c0_i32 = arith.constant 0 : i32
    %c0_i32_0 = arith.constant 0 : i32
    %c0_i32_1 = arith.constant 0 : i32
    return %c0_i32, %c0_i32_0 : i32, i32
  }
  func.func @transform_3(%arg0: i32) -> (i32, i32) {
    %c0_i32 = arith.constant 0 : i32
    %c0_i32_0 = arith.constant 0 : i32
    return %c0_i32, %arg0 : i32, i32
  }
}

</mosaic_0001>

<bundles_post_ra>
// kernel: _encoder_forward_impl.2
= control target key start
LH: loop header
LB: loop body
LE: loop exit
PB: predicated region body
PF: predicated region fallthrough
CT: control target
= control target key end

     0   :  { %s1284_s12 = smov 0   ;;  %s1286_s13 = smov 0   ;;  %s1718_s0 = inlined_call_operand.vmem [shape: f32[8,18], index: 0, kind: input, shape index: {}]   ;;  %s1719_s1 = inlined_call_operand.vmem [shape: f32[18,6534], index: 1, kind: input, shape index: {}]   ;;  %s1720_s2 = inlined_call_operand.vmem [shape: f32[8,1], index: 2, kind: input, shape index: {}]   ;;  %s1721_s3 = inlined_call_operand.vmem [shape: f32[8,6534], index: 3, kind: output, shape index: {}]  }
   0x1   :  { %s1288_s14 = smov 0  }
   0x2 LB: > { %s1149_s15 = sadd.s32 4294967295, %s1261_s14   ;;  %s1301_s16 = sadd.s32 1, %s1261_s14   ;;  %s1261_s14 = sphi %s1288_s14, %s1724_s14   ;;  %s1257_s13 = sphi %s1286_s13, %s1723_s13   ;;  %s1253_s12 = sphi %s1284_s12, %s1722_s12  }
   0x3   : > { %s38_s17 = ssub.s32 %s1261_s14, %s1301_s16  ;;  %s41_s18 = sadd.s32 1, %s1257_s13 }
   0x4   : > { %p39_p0 = scmp.eq.s32.totalorder %s38_s17, 0  ;;  %p48_p1 = scmp.ne.s32.totalorder %s1257_s13, %s1253_s12 }
   0x5   : > { %p49_p2 = scmp.eq.s32.totalorder %s1261_s14, 0  ;;  %p1152_p4 = scmp.ge.s32.totalorder %s1261_s14, 2 }
   0x6   : > { %s1310_s19 = scalar_select %p39_p0, %s1257_s13, %s41_s18  }
   0x7   : > { %p50_p3 = por %p49_p2, %p48_p1  ;;  %127 = sbr.rel (%p1152_p4) target bundleno = 95 (0x5f), region = 24 }
   0xc   : > { %130 = sbr.rel (!%p50_p3) target bundleno = 95 (0x5f), region = 28  ;;  %s132_s20 = sand.u32 (%p50_p3), 1, %s1257_s13  }
   0xd   : > { %s1210_s21 = smul.u32 (%p50_p3), 208, %s1261_s14 }
   0xe   : > { %s1211_s22 = smul.u32 (%p50_p3), 624, %s132_s20 }
   0xf   : > { %s1318_s25 = scalar_lea.vmem (%p50_p3), %s1719_s1, %s1210_s21 }
  0x10   : > { %v150_v0 = vld [vmem:[%s1318_s25] sm:$0xff] (%p50_p3)  ;;  %v152_v1 = vld [vmem:[%s1318_s25 + $0x8] sm:$0xff] (%p50_p3)  ;;  %v154_v2 = vld [vmem:[%s1318_s25 + $0x10] sm:$0xff] (%p50_p3)  ;;  %s1323_s26 = scalar_lea.vmem (%p50_p3), [#allocation2], %s1211_s22 }
  0x11   : > { %151 = vst [vmem:[%s1323_s26] sm:$0xff] %v150_v0  ;;  %v156_v3 = vld [vmem:[%s1318_s25 + $0x18] sm:$0xff]  ;;  %v158_v4 = vld [vmem:[%s1318_s25 + $0x20] sm:$0xff]  ;;  %v160_v5 = vld [vmem:[%s1318_s25 + $0x28] sm:$0xff] }
  0x12   : > { %153 = vst [vmem:[%s1323_s26 + $0x8] sm:$0xff] %v152_v1  ;;  %v162_v6 = vld [vmem:[%s1318_s25 + $0x30] sm:$0xff]  ;;  %v164_v7 = vld [vmem:[%s1318_s25 + $0x38] sm:$0xff]  ;;  %v166_v8 = vld [vmem:[%s1318_s25 + $0x40] sm:$0xff] }
  0x13   : > { %155 = vst [vmem:[%s1323_s26 + $0x10] sm:$0xff] %v154_v2  ;;  %v168_v9 = vld [vmem:[%s1318_s25 + $0x48] sm:$0xff]  ;;  %v170_v10 = vld [vmem:[%s1318_s25 + $0x50] sm:$0xff]  ;;  %v172_v11 = vld [vmem:[%s1318_s25 + $0x58] sm:$0xff] }
  0x14   : > { %157 = vst [vmem:[%s1323_s26 + $0x18] sm:$0xff] %v156_v3  ;;  %v174_v12 = vld [vmem:[%s1318_s25 + $0x60] sm:$0xff]  ;;  %v176_v13 = vld [vmem:[%s1318_s25 + $0x68] sm:$0xff]  ;;  %v178_v14 = vld [vmem:[%s1318_s25 + $0x70] sm:$0xff] }
  0x15   : > { %159 = vst [vmem:[%s1323_s26 + $0x20] sm:$0xff] %v158_v4  ;;  %v180_v15 = vld [vmem:[%s1318_s25 + $0x78] sm:$0xff]  ;;  %v182_v16 = vld [vmem:[%s1318_s25 + $0x80] sm:$0xff]  ;;  %v184_v17 = vld [vmem:[%s1318_s25 + $0x88] sm:$0xff] }
  0x16   : > { %161 = vst [vmem:[%s1323_s26 + $0x28] sm:$0xff] %v160_v5  ;;  %v186_v18 = vld [vmem:[%s1318_s25 + $0x90] sm:$0xff]  ;;  %v188_v19 = vld [vmem:[%s1318_s25 + $0x98] sm:$0xff]  ;;  %v190_v20 = vld [vmem:[%s1318_s25 + $0xa0] sm:$0xff] }
  0x17   : > { %163 = vst [vmem:[%s1323_s26 + $0x30] sm:$0xff] %v162_v6  ;;  %v192_v21 = vld [vmem:[%s1318_s25 + $0xa8] sm:$0xff]  ;;  %v194_v22 = vld [vmem:[%s1318_s25 + $0xb0] sm:$0xff]  ;;  %v196_v23 = vld [vmem:[%s1318_s25 + $0xb8] sm:$0xff] }
  0x18   : > { %165 = vst [vmem:[%s1323_s26 + $0x38] sm:$0xff] %v164_v7  ;;  %v198_v24 = vld [vmem:[%s1318_s25 + $0xc0] sm:$0xff]  ;;  %v200_v25 = vld [vmem:[%s1318_s25 + $0xc8] sm:$0xff]  ;;  %v206_v28 = vld [vmem:[%s1318_s25 + $0x1b0] sm:$0xff] }
  0x19   : > { %167 = vst [vmem:[%s1323_s26 + $0x40] sm:$0xff] %v166_v8  ;;  %v202_v26 = vld [vmem:[%s1318_s25 + $0x1a0] sm:$0xff]  ;;  %v204_v27 = vld [vmem:[%s1318_s25 + $0x1a8] sm:$0xff]  ;;  %v208_v29 = vld [vmem:[%s1318_s25 + $0x1b8] sm:$0xff] }
  0x1a   : > { %169 = vst [vmem:[%s1323_s26 + $0x48] sm:$0xff] %v168_v9  ;;  %v210_v30 = vld [vmem:[%s1318_s25 + $0x1c0] sm:$0xff]  ;;  %v212_v31 = vld [vmem:[%s1318_s25 + $0x1c8] sm:$0xff]  ;;  %v214_v32 = vld [vmem:[%s1318_s25 + $0x1d0] sm:$0xff] }
  0x1b   : > { %171 = vst [vmem:[%s1323_s26 + $0x50] sm:$0xff] %v170_v10  ;;  %v216_v33 = vld [vmem:[%s1318_s25 + $0x1d8] sm:$0xff]  ;;  %v218_v34 = vld [vmem:[%s1318_s25 + $0x1e0] sm:$0xff]  ;;  %v220_v35 = vld [vmem:[%s1318_s25 + $0x1e8] sm:$0xff] }
  0x1c   : > { %173 = vst [vmem:[%s1323_s26 + $0x58] sm:$0xff] %v172_v11  ;;  %v222_v36 = vld [vmem:[%s1318_s25 + $0x1f0] sm:$0xff]  ;;  %v224_v37 = vld [vmem:[%s1318_s25 + $0x1f8] sm:$0xff]  ;;  %v226_v38 = vld [vmem:[%s1318_s25 + $0x200] sm:$0xff] }
  0x1d   : > { %175 = vst [vmem:[%s1323_s26 + $0x60] sm:$0xff] %v174_v12  ;;  %v228_v39 = vld [vmem:[%s1318_s25 + $0x208] sm:$0xff]  ;;  %v230_v40 = vld [vmem:[%s1318_s25 + $0x210] sm:$0xff]  ;;  %v232_v41 = vld [vmem:[%s1318_s25 + $0x218] sm:$0xff] }
  0x1e   : > { %177 = vst [vmem:[%s1323_s26 + $0x68] sm:$0xff] %v176_v13  ;;  %v234_v42 = vld [vmem:[%s1318_s25 + $0x220] sm:$0xff]  ;;  %v236_v43 = vld [vmem:[%s1318_s25 + $0x228] sm:$0xff]  ;;  %v238_v44 = vld [vmem:[%s1318_s25 + $0x230] sm:$0xff] }
  0x1f   : > { %179 = vst [vmem:[%s1323_s26 + $0x70] sm:$0xff] %v178_v14  ;;  %v240_v45 = vld [vmem:[%s1318_s25 + $0x238] sm:$0xff]  ;;  %v242_v46 = vld [vmem:[%s1318_s25 + $0x240] sm:$0xff]  ;;  %v244_v47 = vld [vmem:[%s1318_s25 + $0x248] sm:$0xff] }
  0x20   : > { %181 = vst [vmem:[%s1323_s26 + $0x78] sm:$0xff] %v180_v15  ;;  %v246_v48 = vld [vmem:[%s1318_s25 + $0x250] sm:$0xff]  ;;  %v248_v49 = vld [vmem:[%s1318_s25 + $0x258] sm:$0xff]  ;;  %v250_v50 = vld [vmem:[%s1318_s25 + $0x260] sm:$0xff] }
  0x21   : > { %183 = vst [vmem:[%s1323_s26 + $0x80] sm:$0xff] %v182_v16  ;;  %v252_v51 = vld [vmem:[%s1318_s25 + $0x268] sm:$0xff]  ;;  %v254_v52 = vld [vmem:[%s1318_s25 + $0x340] sm:$0xff]  ;;  %v258_v54 = vld [vmem:[%s1318_s25 + $0x350] sm:$0xff] }
  0x22   : > { %185 = vst [vmem:[%s1323_s26 + $0x88] sm:$0xff] %v184_v17  ;;  %v256_v53 = vld [vmem:[%s1318_s25 + $0x348] sm:$0xff]  ;;  %v260_v55 = vld [vmem:[%s1318_s25 + $0x358] sm:$0xff]  ;;  %v262_v56 = vld [vmem:[%s1318_s25 + $0x360] sm:$0xff] }
  0x23   : > { %187 = vst [vmem:[%s1323_s26 + $0x90] sm:$0xff] %v186_v18  ;;  %v264_v57 = vld [vmem:[%s1318_s25 + $0x368] sm:$0xff]  ;;  %v266_v58 = vld [vmem:[%s1318_s25 + $0x370] sm:$0xff]  ;;  %v268_v59 = vld [vmem:[%s1318_s25 + $0x378] sm:$0xff] }
  0x24   : > { %189 = vst [vmem:[%s1323_s26 + $0x98] sm:$0xff] %v188_v19  ;;  %v270_v60 = vld [vmem:[%s1318_s25 + $0x380] sm:$0xff]  ;;  %v272_v61 = vld [vmem:[%s1318_s25 + $0x388] sm:$0xff]  ;;  %v274_v62 = vld [vmem:[%s1318_s25 + $0x390] sm:$0xff] }
  0x25   : > { %191 = vst [vmem:[%s1323_s26 + $0xa0] sm:$0xff] %v190_v20  ;;  %v276_v63 = vld [vmem:[%s1318_s25 + $0x398] sm:$0xff]  ;;  %v278_v0 = vld [vmem:[%s1318_s25 + $0x3a0] sm:$0xff]  ;;  %v280_v1 = vld [vmem:[%s1318_s25 + $0x3a8] sm:$0xff] }
  0x26   : > { %193 = vst [vmem:[%s1323_s26 + $0xa8] sm:$0xff] %v192_v21  ;;  %v282_v2 = vld [vmem:[%s1318_s25 + $0x3b0] sm:$0xff]  ;;  %v284_v3 = vld [vmem:[%s1318_s25 + $0x3b8] sm:$0xff]  ;;  %v286_v4 = vld [vmem:[%s1318_s25 + $0x3c0] sm:$0xff] }
  0x27   : > { %195 = vst [vmem:[%s1323_s26 + $0xb0] sm:$0xff] %v194_v22  ;;  %v288_v5 = vld [vmem:[%s1318_s25 + $0x3c8] sm:$0xff]  ;;  %v290_v6 = vld [vmem:[%s1318_s25 + $0x3d0] sm:$0xff]  ;;  %v292_v7 = vld [vmem:[%s1318_s25 + $0x3d8] sm:$0xff] }
  0x28   : > { %197 = vst [vmem:[%s1323_s26 + $0xb8] sm:$0xff] %v196_v23  ;;  %v294_v8 = vld [vmem:[%s1318_s25 + $0x3e0] sm:$0xff]  ;;  %v296_v9 = vld [vmem:[%s1318_s25 + $0x3e8] sm:$0xff]  ;;  %v298_v10 = vld [vmem:[%s1318_s25 + $0x3f0] sm:$0xff] }
  0x29   : > { %199 = vst [vmem:[%s1323_s26 + $0xc0] sm:$0xff] %v198_v24  ;;  %v300_v11 = vld [vmem:[%s1318_s25 + $0x3f8] sm:$0xff]  ;;  %v302_v12 = vld [vmem:[%s1318_s25 + $0x400] sm:$0xff]  ;;  %v304_v13 = vld [vmem:[%s1318_s25 + $0x408] sm:$0xff] }
  0x2a   : > { %201 = vst [vmem:[%s1323_s26 + $0xc8] sm:$0xff] %v200_v25 }
  0x2b   : > { %203 = vst [vmem:[%s1323_s26 + $0xd0] sm:$0xff] %v202_v26 }
  0x2c   : > { %205 = vst [vmem:[%s1323_s26 + $0xd8] sm:$0xff] %v204_v27 }
  0x2d   : > { %207 = vst [vmem:[%s1323_s26 + $0xe0] sm:$0xff] %v206_v28 }
  0x2e   : > { %209 = vst [vmem:[%s1323_s26 + $0xe8] sm:$0xff] %v208_v29 }
  0x2f   : > { %211 = vst [vmem:[%s1323_s26 + $0xf0] sm:$0xff] %v210_v30 }
  0x30   : > { %213 = vst [vmem:[%s1323_s26 + $0xf8] sm:$0xff] %v212_v31 }
  0x31   : > { %215 = vst [vmem:[%s1323_s26 + $0x100] sm:$0xff] %v214_v32 }
  0x32   : > { %217 = vst [vmem:[%s1323_s26 + $0x108] sm:$0xff] %v216_v33 }
  0x33   : > { %219 = vst [vmem:[%s1323_s26 + $0x110] sm:$0xff] %v218_v34 }
  0x34   : > { %221 = vst [vmem:[%s1323_s26 + $0x118] sm:$0xff] %v220_v35 }
  0x35   : > { %223 = vst [vmem:[%s1323_s26 + $0x120] sm:$0xff] %v222_v36 }
  0x36   : > { %225 = vst [vmem:[%s1323_s26 + $0x128] sm:$0xff] %v224_v37 }
  0x37   : > { %227 = vst [vmem:[%s1323_s26 + $0x130] sm:$0xff] %v226_v38 }
  0x38   : > { %229 = vst [vmem:[%s1323_s26 + $0x138] sm:$0xff] %v228_v39 }
  0x39   : > { %231 = vst [vmem:[%s1323_s26 + $0x140] sm:$0xff] %v230_v40 }
  0x3a   : > { %233 = vst [vmem:[%s1323_s26 + $0x148] sm:$0xff] %v232_v41 }
  0x3b   : > { %235 = vst [vmem:[%s1323_s26 + $0x150] sm:$0xff] %v234_v42 }
  0x3c   : > { %237 = vst [vmem:[%s1323_s26 + $0x158] sm:$0xff] %v236_v43 }
  0x3d   : > { %239 = vst [vmem:[%s1323_s26 + $0x160] sm:$0xff] %v238_v44 }
  0x3e   : > { %241 = vst [vmem:[%s1323_s26 + $0x168] sm:$0xff] %v240_v45 }
  0x3f   : > { %243 = vst [vmem:[%s1323_s26 + $0x170] sm:$0xff] %v242_v46 }
  0x40   : > { %245 = vst [vmem:[%s1323_s26 + $0x178] sm:$0xff] %v244_v47 }
  0x41   : > { %247 = vst [vmem:[%s1323_s26 + $0x180] sm:$0xff] %v246_v48 }
  0x42   : > { %249 = vst [vmem:[%s1323_s26 + $0x188] sm:$0xff] %v248_v49 }
  0x43   : > { %251 = vst [vmem:[%s1323_s26 + $0x190] sm:$0xff] %v250_v50 }
  0x44   : > { %253 = vst [vmem:[%s1323_s26 + $0x198] sm:$0xff] %v252_v51 }
  0x45   : > { %255 = vst [vmem:[%s1323_s26 + $0x1a0] sm:$0xff] %v254_v52 }
  0x46   : > { %257 = vst [vmem:[%s1323_s26 + $0x1a8] sm:$0xff] %v256_v53 }
  0x47   : > { %259 = vst [vmem:[%s1323_s26 + $0x1b0] sm:$0xff] %v258_v54 }
  0x48   : > { %261 = vst [vmem:[%s1323_s26 + $0x1b8] sm:$0xff] %v260_v55 }
  0x49   : > { %263 = vst [vmem:[%s1323_s26 + $0x1c0] sm:$0xff] %v262_v56 }
  0x4a   : > { %265 = vst [vmem:[%s1323_s26 + $0x1c8] sm:$0xff] %v264_v57 }
  0x4b   : > { %267 = vst [vmem:[%s1323_s26 + $0x1d0] sm:$0xff] %v266_v58 }
  0x4c   : > { %269 = vst [vmem:[%s1323_s26 + $0x1d8] sm:$0xff] %v268_v59 }
  0x4d   : > { %271 = vst [vmem:[%s1323_s26 + $0x1e0] sm:$0xff] %v270_v60 }
  0x4e   : > { %273 = vst [vmem:[%s1323_s26 + $0x1e8] sm:$0xff] %v272_v61 }
  0x4f   : > { %275 = vst [vmem:[%s1323_s26 + $0x1f0] sm:$0xff] %v274_v62 }
  0x50   : > { %277 = vst [vmem:[%s1323_s26 + $0x1f8] sm:$0xff] %v276_v63 }
  0x51   : > { %279 = vst [vmem:[%s1323_s26 + $0x200] sm:$0xff] %v278_v0 }
  0x52   : > { %281 = vst [vmem:[%s1323_s26 + $0x208] sm:$0xff] %v280_v1 }
  0x53   : > { %283 = vst [vmem:[%s1323_s26 + $0x210] sm:$0xff] %v282_v2 }
  0x54   : > { %285 = vst [vmem:[%s1323_s26 + $0x218] sm:$0xff] %v284_v3 }
  0x55   : > { %287 = vst [vmem:[%s1323_s26 + $0x220] sm:$0xff] %v286_v4 }
  0x56   : > { %289 = vst [vmem:[%s1323_s26 + $0x228] sm:$0xff] %v288_v5 }
  0x57   : > { %291 = vst [vmem:[%s1323_s26 + $0x230] sm:$0xff] %v290_v6 }
  0x58   : > { %293 = vst [vmem:[%s1323_s26 + $0x238] sm:$0xff] %v292_v7 }
  0x59   : > { %295 = vst [vmem:[%s1323_s26 + $0x240] sm:$0xff] %v294_v8 }
  0x5a   : > { %297 = vst [vmem:[%s1323_s26 + $0x248] sm:$0xff] %v296_v9 }
  0x5b   : > { %299 = vst [vmem:[%s1323_s26 + $0x250] sm:$0xff] %v298_v10 }
  0x5c   : > { %301 = vst [vmem:[%s1323_s26 + $0x258] sm:$0xff] %v300_v11 }
  0x5d   : > { %303 = vst [vmem:[%s1323_s26 + $0x260] sm:$0xff] %v302_v12 }
  0x5e   : > { %305 = vst [vmem:[%s1323_s26 + $0x268] sm:$0xff] %v304_v13 }
  0x5f PF: > { %p1154_p5 = scmp.ge.s32.totalorder %s1261_s14, 1  ;;  %p310_p6 = scmp.lt.s32.totalorder %s1261_s14, 3 }
  0x61   : > { %p311_p7 = pnand %p1154_p5, %p310_p6 }
  0x62   : > { %s317_s27 = sand.u32 (!%p311_p7), 1, %s1253_s12   ;;  %s341_s7 = smul.u32 (!%p311_p7), 26, %s1149_s15 }
  0x63   : > { %314 = sbr.rel (%p311_p7) target bundleno = 293 (0x125), region = 51 }
  0x64   : > { %s1212_s30 = smul.u32 (!%p311_p7), 624, %s317_s27  ;;  %p342_p8 = scmp.lt.s32.totalorder (!%p311_p7), %s341_s7, 51 }
  0x66   : > { %s1484_s4 = scalar_lea.vmem (!%p311_p7), [#allocation2], %s1212_s30 }
  0x68   : > { %v426_v14 = vld [vmem:[%s1720_s2] sm:$0xff]  ;;  %v1263_v15 = vmov 0   ;;  %vm436_vm0 = vcmask 1041408   ;;  %v401_v17 = vld [vmem:[%s1484_s4 + $0x1a8] sm:$0x3]  ;;  %v375_v19 = vld [vmem:[%s1484_s4 + $0xd8] sm:$0xff] }
  0x69   : > { %1238 = vset.pattern.permute.xlu0 %v1263_v15  ;;  %v400_v16 = vld [vmem:[%s1484_s4 + $0x1a0] sm:$0x3]  ;;  %v374_v18 = vld [vmem:[%s1484_s4 + $0xd0] sm:$0xff]  ;;  %1158 = vmatpush.msk.msra.mxu1 %vm436_vm0, %v401_v17  ;;  %v403_v21 = vld [vmem:[%s1484_s4 + $0x1b8] sm:$0x3]  ;;  %vm432_vm1 = vcmask 146432  }
  0x6a   : > { %429 = vperm.xlu0 %1238, %v426_v14   ;;  %1156 = vmatpush.msk.msra.mxu0 %vm436_vm0, %v400_v16  ;;  %v402_v20 = vld [vmem:[%s1484_s4 + $0x1b0] sm:$0x3]  ;;  %v348_v22 = vld [vmem:[%s1484_s4] sm:$0xff]  ;;  %v349_v23 = vld [vmem:[%s1484_s4 + $0x8] sm:$0xff]  ;;  %s1726_s7 = smov (!%p342_p8, %s341_s7), 51 }
  0x6b   : > { %1160 = vmatpush.msk.msra.mxu2 %vm436_vm0, %v402_v20  ;;  %1162 = vmatpush.msk.msra.mxu3 %vm436_vm0, %v403_v21  ;;  %v376_v24 = vld [vmem:[%s1484_s4 + $0xe0] sm:$0xff]  ;;  %v377_v25 = vld [vmem:[%s1484_s4 + $0xe8] sm:$0xff]  ;;  %v350_v29 = vld [vmem:[%s1484_s4 + $0x10] sm:$0xff]  ;;  %s1155_s8 = sshll.u32 %s1726_s7, 3 }
  0x6c   : > { %529 = vmatpush.msra.mxu0 %v374_v18  ;;  %549 = vmatpush.msra.mxu1 %v375_v19  ;;  %v1503_v26 = vld [vmem:[%s1718_s0] sm:$0xff]  ;;  %v405_v28 = vld [vmem:[%s1484_s4 + $0x1c8] sm:$0x3]  ;;  %v351_v30 = vld [vmem:[%s1484_s4 + $0x18] sm:$0xff]  ;;  %s1656_s11 = scalar_lea.vmem %s1721_s3, %s1155_s8 }
  0x6d   : > { %569 = vmatpush.msra.mxu2 %v376_v24  ;;  %589 = vmatpush.msra.mxu3 %v377_v25  ;;  %v404_v27 = vld [vmem:[%s1484_s4 + $0x1c0] sm:$0x3]  ;;  %v406_v31 = vld [vmem:[%s1484_s4 + $0x1d0] sm:$0x3]  ;;  %v407_v32 = vld [vmem:[%s1484_s4 + $0x1d8] sm:$0x3] }
  0x6e   : > { %530 = vmatpush.msra.mxu0 %v348_v22  ;;  %550 = vmatpush.msra.mxu1 %v349_v23  ;;  %v378_v33 = vld [vmem:[%s1484_s4 + $0xf0] sm:$0xff]  ;;  %v379_v34 = vld [vmem:[%s1484_s4 + $0xf8] sm:$0xff]  ;;  %v380_v35 = vld [vmem:[%s1484_s4 + $0x100] sm:$0xff] }
  0x6f   : > { %1157 = vmatmul.msk.f32.vlgmr.msra.gmra.mxu0 %vm432_vm1, %v1503_v26  ;;  %1159 = vmatmul.msk.f32.vlgmr.msra.gmra.mxu1 %vm432_vm1, %v1503_v26  ;;  %v381_v36 = vld [vmem:[%s1484_s4 + $0x108] sm:$0xff]  ;;  %v352_v37 = vld [vmem:[%s1484_s4 + $0x20] sm:$0xff]  ;;  %v354_v39 = vld [vmem:[%s1484_s4 + $0x30] sm:$0xff] }
  0x70   : > { %1164 = vmatpush.msk.msrb.mxu0 %vm436_vm0, %v404_v27  ;;  %1166 = vmatpush.msk.msrb.mxu1 %vm436_vm0, %v405_v28  ;;  %v353_v38 = vld [vmem:[%s1484_s4 + $0x28] sm:$0xff]  ;;  %v355_v40 = vld [vmem:[%s1484_s4 + $0x38] sm:$0xff]  ;;  %v408_v41 = vld [vmem:[%s1484_s4 + $0x1e0] sm:$0x3] }
  0x71   : > { %570 = vmatpush.msra.mxu2 %v350_v29  ;;  %590 = vmatpush.msra.mxu3 %v351_v30  ;;  %v409_v42 = vld [vmem:[%s1484_s4 + $0x1e8] sm:$0x3]  ;;  %v410_v43 = vld [vmem:[%s1484_s4 + $0x1f0] sm:$0x3]  ;;  %v411_v44 = vld [vmem:[%s1484_s4 + $0x1f8] sm:$0x3] }
  0x72   : > { %1161 = vmatmul.msk.f32.vlgmr.msra.gmra.mxu2 %vm432_vm1, %v1503_v26  ;;  %1163 = vmatmul.msk.f32.vlgmr.msra.gmra.mxu3 %vm432_vm1, %v1503_v26  ;;  %v382_v45 = vld [vmem:[%s1484_s4 + $0x110] sm:$0xff]  ;;  %v383_v46 = vld [vmem:[%s1484_s4 + $0x118] sm:$0xff]  ;;  %v384_v47 = vld [vmem:[%s1484_s4 + $0x120] sm:$0xff] }
  0x73   : > { %1168 = vmatpush.msk.msrb.mxu2 %vm436_vm0, %v406_v31  ;;  %1170 = vmatpush.msk.msrb.mxu3 %vm436_vm0, %v407_v32  ;;  %v385_v48 = vld [vmem:[%s1484_s4 + $0x128] sm:$0xff]  ;;  %v356_v49 = vld [vmem:[%s1484_s4 + $0x40] sm:$0xff]  ;;  %v358_v51 = vld [vmem:[%s1484_s4 + $0x50] sm:$0xff] }
  0x74   : > { %609 = vmatpush.msrb.mxu0 %v378_v33  ;;  %629 = vmatpush.msrb.mxu1 %v379_v34  ;;  %v357_v50 = vld [vmem:[%s1484_s4 + $0x48] sm:$0xff]  ;;  %v359_v52 = vld [vmem:[%s1484_s4 + $0x58] sm:$0xff]  ;;  %v412_v53 = vld [vmem:[%s1484_s4 + $0x200] sm:$0x3] }
  0x75   : > { %649 = vmatpush.msrb.mxu2 %v380_v35  ;;  %669 = vmatpush.msrb.mxu3 %v381_v36  ;;  %v413_v54 = vld [vmem:[%s1484_s4 + $0x208] sm:$0x3]  ;;  %v414_v55 = vld [vmem:[%s1484_s4 + $0x210] sm:$0x3]  ;;  %v415_v56 = vld [vmem:[%s1484_s4 + $0x218] sm:$0x3] }
  0x76   : > { %610 = vmatpush.msrb.mxu0 %v352_v37  ;;  %630 = vmatpush.msrb.mxu1 %v353_v38  ;;  %v386_v57 = vld [vmem:[%s1484_s4 + $0x130] sm:$0xff]  ;;  %v387_v58 = vld [vmem:[%s1484_s4 + $0x138] sm:$0xff]  ;;  %v388_v59 = vld [vmem:[%s1484_s4 + $0x140] sm:$0xff] }
  0x77   : > { %1165 = vmatmul.msk.f32.vlgmr.msrb.gmra.mxu0 %vm432_vm1, %v1503_v26  ;;  %1167 = vmatmul.msk.f32.vlgmr.msrb.gmra.mxu1 %vm432_vm1, %v1503_v26  ;;  %v389_v60 = vld [vmem:[%s1484_s4 + $0x148] sm:$0xff]  ;;  %v360_v61 = vld [vmem:[%s1484_s4 + $0x60] sm:$0xff]  ;;  %v362_v63 = vld [vmem:[%s1484_s4 + $0x70] sm:$0xff] }
  0x78   : > { %650 = vmatpush.msrb.mxu2 %v354_v39  ;;  %670 = vmatpush.msrb.mxu3 %v355_v40  ;;  %v361_v62 = vld [vmem:[%s1484_s4 + $0x68] sm:$0xff]  ;;  %v363_v0 = vld [vmem:[%s1484_s4 + $0x78] sm:$0xff]  ;;  %v416_v1 = vld [vmem:[%s1484_s4 + $0x220] sm:$0x3] }
  0x79   : > { %1172 = vmatpush.msk.msra.mxu0 %vm436_vm0, %v408_v41  ;;  %1174 = vmatpush.msk.msra.mxu1 %vm436_vm0, %v409_v42  ;;  %v417_v2 = vld [vmem:[%s1484_s4 + $0x228] sm:$0x3]  ;;  %v418_v3 = vld [vmem:[%s1484_s4 + $0x230] sm:$0x3]  ;;  %v419_v4 = vld [vmem:[%s1484_s4 + $0x238] sm:$0x3] }
  0x7a   : > { %1169 = vmatmul.msk.f32.vlgmr.msrb.gmra.mxu2 %vm432_vm1, %v1503_v26  ;;  %1171 = vmatmul.msk.f32.vlgmr.msrb.gmra.mxu3 %vm432_vm1, %v1503_v26  ;;  %v390_v5 = vld [vmem:[%s1484_s4 + $0x150] sm:$0xff]  ;;  %v391_v6 = vld [vmem:[%s1484_s4 + $0x158] sm:$0xff]  ;;  %v392_v7 = vld [vmem:[%s1484_s4 + $0x160] sm:$0xff] }
  0x7b   : > { %1176 = vmatpush.msk.msra.mxu2 %vm436_vm0, %v410_v43  ;;  %1178 = vmatpush.msk.msra.mxu3 %vm436_vm0, %v411_v44  ;;  %v393_v8 = vld [vmem:[%s1484_s4 + $0x168] sm:$0xff]  ;;  %v364_v9 = vld [vmem:[%s1484_s4 + $0x80] sm:$0xff]  ;;  %v366_v11 = vld [vmem:[%s1484_s4 + $0x90] sm:$0xff] }
  0x7c   : > { %689 = vmatpush.msra.mxu0 %v382_v45  ;;  %709 = vmatpush.msra.mxu1 %v383_v46  ;;  %v365_v10 = vld [vmem:[%s1484_s4 + $0x88] sm:$0xff]  ;;  %v367_v12 = vld [vmem:[%s1484_s4 + $0x98] sm:$0xff]  ;;  %v420_v13 = vld [vmem:[%s1484_s4 + $0x240] sm:$0x3] }
  0x7d   : > { %729 = vmatpush.msra.mxu2 %v384_v47  ;;  %749 = vmatpush.msra.mxu3 %v385_v48  ;;  %v421_v14 = vld [vmem:[%s1484_s4 + $0x248] sm:$0x3]  ;;  %v422_v15 = vld [vmem:[%s1484_s4 + $0x250] sm:$0x3]  ;;  %v423_v16 = vld [vmem:[%s1484_s4 + $0x258] sm:$0x3] }
  0x7e   : > { %690 = vmatpush.msra.mxu0 %v356_v49  ;;  %710 = vmatpush.msra.mxu1 %v357_v50  ;;  %v394_v17 = vld [vmem:[%s1484_s4 + $0x170] sm:$0xff]  ;;  %v395_v18 = vld [vmem:[%s1484_s4 + $0x178] sm:$0xff]  ;;  %v396_v19 = vld [vmem:[%s1484_s4 + $0x180] sm:$0xff] }
  0x7f   : > { %1173 = vmatmul.msk.f32.vlgmr.msra.gmra.mxu0 %vm432_vm1, %v1503_v26  ;;  %1175 = vmatmul.msk.f32.vlgmr.msra.gmra.mxu1 %vm432_vm1, %v1503_v26  ;;  %v397_v20 = vld [vmem:[%s1484_s4 + $0x188] sm:$0xff]  ;;  %v368_v21 = vld [vmem:[%s1484_s4 + $0xa0] sm:$0xff]  ;;  %v370_v23 = vld [vmem:[%s1484_s4 + $0xb0] sm:$0xff] }
  0x80   : > { %730 = vmatpush.msra.mxu2 %v358_v51  ;;  %750 = vmatpush.msra.mxu3 %v359_v52  ;;  %v369_v22 = vld [vmem:[%s1484_s4 + $0xa8] sm:$0xff]  ;;  %v371_v24 = vld [vmem:[%s1484_s4 + $0xb8] sm:$0xff]  ;;  %v424_v25 = vld [vmem:[%s1484_s4 + $0x260] sm:$0x3] }
  0x81   : > { %1180 = vmatpush.msk.msrb.mxu0 %vm436_vm0, %v412_v53  ;;  %1182 = vmatpush.msk.msrb.mxu1 %vm436_vm0, %v413_v54  ;;  %v425_v27 = vld [vmem:[%s1484_s4 + $0x268] sm:$0x3]  ;;  %v398_v28 = vld [vmem:[%s1484_s4 + $0x190] sm:$0xff]  ;;  %v399_v29 = vld [vmem:[%s1484_s4 + $0x198] sm:$0xff] }
  0x82   : > { %1177 = vmatmul.msk.f32.vlgmr.msra.gmra.mxu2 %vm432_vm1, %v1503_v26  ;;  %1179 = vmatmul.msk.f32.vlgmr.msra.gmra.mxu3 %vm432_vm1, %v1503_v26  ;;  %v372_v30 = vld [vmem:[%s1484_s4 + $0xc0] sm:$0xff]  ;;  %v373_v31 = vld [vmem:[%s1484_s4 + $0xc8] sm:$0xff] }
  0x83   : > { %1184 = vmatpush.msk.msrb.mxu2 %vm436_vm0, %v414_v55  ;;  %1186 = vmatpush.msk.msrb.mxu3 %vm436_vm0, %v415_v56 }
  0x84   : > { %769 = vmatpush.msrb.mxu0 %v386_v57  ;;  %789 = vmatpush.msrb.mxu1 %v387_v58 }
  0x85   : > { %809 = vmatpush.msrb.mxu2 %v388_v59  ;;  %829 = vmatpush.msrb.mxu3 %v389_v60 }
  0x86   : > { %770 = vmatpush.msrb.mxu0 %v360_v61  ;;  %790 = vmatpush.msrb.mxu1 %v361_v62 }
  0x87   : > { %1181 = vmatmul.msk.f32.vlgmr.msrb.gmra.mxu0 %vm432_vm1, %v1503_v26  ;;  %1183 = vmatmul.msk.f32.vlgmr.msrb.gmra.mxu1 %vm432_vm1, %v1503_v26 }
  0x88   : > { %810 = vmatpush.msrb.mxu2 %v362_v63  ;;  %830 = vmatpush.msrb.mxu3 %v363_v0 }
  0x89   : > { %1188 = vmatpush.msk.msra.mxu0 %vm436_vm0, %v416_v1  ;;  %1190 = vmatpush.msk.msra.mxu1 %vm436_vm0, %v417_v2 }
  0x8a   : > { %1185 = vmatmul.msk.f32.vlgmr.msrb.gmra.mxu2 %vm432_vm1, %v1503_v26  ;;  %1187 = vmatmul.msk.f32.vlgmr.msrb.gmra.mxu3 %vm432_vm1, %v1503_v26 }
  0x8b   : > { %1192 = vmatpush.msk.msra.mxu2 %vm436_vm0, %v418_v3  ;;  %1194 = vmatpush.msk.msra.mxu3 %vm436_vm0, %v419_v4 }
  0x8c   : > { %849 = vmatpush.msra.mxu0 %v390_v5  ;;  %869 = vmatpush.msra.mxu1 %v391_v6 }
  0x8d   : > { %889 = vmatpush.msra.mxu2 %v392_v7  ;;  %909 = vmatpush.msra.mxu3 %v393_v8 }
  0x8e   : > { %850 = vmatpush.msra.mxu0 %v364_v9  ;;  %870 = vmatpush.msra.mxu1 %v365_v10 }
  0x8f   : > { %1189 = vmatmul.msk.f32.vlgmr.msra.gmra.mxu0 %vm432_vm1, %v1503_v26  ;;  %1191 = vmatmul.msk.f32.vlgmr.msra.gmra.mxu1 %vm432_vm1, %v1503_v26 }
  0x90   : > { %890 = vmatpush.msra.mxu2 %v366_v11  ;;  %910 = vmatpush.msra.mxu3 %v367_v12 }
  0x91   : > { %1196 = vmatpush.msk.msrb.mxu0 %vm436_vm0, %v420_v13  ;;  %1198 = vmatpush.msk.msrb.mxu1 %vm436_vm0, %v421_v14 }
  0x92   : > { %1193 = vmatmul.msk.f32.vlgmr.msra.gmra.mxu2 %vm432_vm1, %v1503_v26  ;;  %1195 = vmatmul.msk.f32.vlgmr.msra.gmra.mxu3 %vm432_vm1, %v1503_v26 }
  0x93   : > { %1200 = vmatpush.msk.msrb.mxu2 %vm436_vm0, %v422_v15  ;;  %1202 = vmatpush.msk.msrb.mxu3 %vm436_vm0, %v423_v16 }
  0x94   : > { %929 = vmatpush.msrb.mxu0 %v394_v17  ;;  %949 = vmatpush.msrb.mxu1 %v395_v18 }
  0x95   : > { %969 = vmatpush.msrb.mxu2 %v396_v19  ;;  %989 = vmatpush.msrb.mxu3 %v397_v20 }
  0x96   : > { %930 = vmatpush.msrb.mxu0 %v368_v21  ;;  %950 = vmatpush.msrb.mxu1 %v369_v22 }
  0x97   : > { %1197 = vmatmul.msk.f32.vlgmr.msrb.gmra.mxu0 %vm432_vm1, %v1503_v26  ;;  %1199 = vmatmul.msk.f32.vlgmr.msrb.gmra.mxu1 %vm432_vm1, %v1503_v26 }
  0x98   : > { %970 = vmatpush.msrb.mxu2 %v370_v23  ;;  %990 = vmatpush.msrb.mxu3 %v371_v24 }
  0x99   : > { %1204 = vmatpush.msk.msra.mxu0 %vm436_vm0, %v424_v25  ;;  %1206 = vmatpush.msk.msra.mxu1 %vm436_vm0, %v425_v27 }
  0x9a   : > { %1201 = vmatmul.msk.f32.vlgmr.msrb.gmra.mxu2 %vm432_vm1, %v1503_v26  ;;  %1203 = vmatmul.msk.f32.vlgmr.msrb.gmra.mxu3 %vm432_vm1, %v1503_v26 }
  0x9b   : > { %1009 = vmatpush.msra.mxu0 %v398_v28  ;;  %1029 = vmatpush.msra.mxu1 %v399_v29 }
  0x9d   : > { %1010 = vmatpush.msra.mxu0 %v372_v30  ;;  %1030 = vmatpush.msra.mxu1 %v373_v31 }
  0x9f   : > { %1205 = vmatmul.msk.f32.vlgmr.msra.gmra.mxu0 %vm432_vm1, %v1503_v26  ;;  %1207 = vmatmul.msk.f32.vlgmr.msra.gmra.mxu1 %vm432_vm1, %v1503_v26 }
  0xdc   : > { %v1649_v32 = vpop.permute.xlu0 %429 }
  0xec   : > { %v532_v33 = vpop.f32.mrf.mxu0  ;;  %v552_v34 = vpop.f32.mrf.mxu1 }
  0xed   : > { %v533_v35 = vadd.f32 %v532_v33, %v1649_v32  ;;  %v553_v36 = vadd.f32 %v552_v34, %v1649_v32 }
  0xef   : > { %v1035_v26 = vmax.f32 %v533_v35, 0.0  ;;  %v1036_v37 = vmax.f32 %v553_v36, 0.0 }
  0xf1   : > { %1061 = vst [vmem:[%s1656_s11] sm:$0xff] %v1035_v26 }
  0xf2   : > { %1062 = vst [vmem:[%s1656_s11 + $0x8] sm:$0xff] %v1036_v37 }
  0xf4   : > { %v612_v38 = vpop.f32.mrf.mxu0  ;;  %v632_v39 = vpop.f32.mrf.mxu1 }
  0xf5   : > { %v572_v40 = vpop.f32.mrf.mxu2  ;;  %v592_v41 = vpop.f32.mrf.mxu3  ;;  %v613_v42 = vadd.f32 %v612_v38, %v1649_v32  ;;  %v633_v43 = vadd.f32 %v632_v39, %v1649_v32 }
  0xf6   : > { %v573_v44 = vadd.f32 %v572_v40, %v1649_v32  ;;  %v593_v45 = vadd.f32 %v592_v41, %v1649_v32 }
  0xf7   : > { %v1039_v46 = vmax.f32 %v613_v42, 0.0  ;;  %v1040_v49 = vmax.f32 %v633_v43, 0.0 }
  0xf8   : > { %v1037_v47 = vmax.f32 %v573_v44, 0.0  ;;  %v1038_v48 = vmax.f32 %v593_v45, 0.0 }
  0xf9   : > { %1065 = vst [vmem:[%s1656_s11 + $0x20] sm:$0xff] %v1039_v46 }
  0xfa   : > { %1063 = vst [vmem:[%s1656_s11 + $0x10] sm:$0xff] %v1037_v47 }
  0xfb   : > { %1064 = vst [vmem:[%s1656_s11 + $0x18] sm:$0xff] %v1038_v48 }
  0xfc   : > { %1066 = vst [vmem:[%s1656_s11 + $0x28] sm:$0xff] %v1040_v49  ;;  %v692_v50 = vpop.f32.mrf.mxu0  ;;  %v712_v51 = vpop.f32.mrf.mxu1 }
  0xfd   : > { %v652_v52 = vpop.f32.mrf.mxu2  ;;  %v672_v53 = vpop.f32.mrf.mxu3  ;;  %v693_v54 = vadd.f32 %v692_v50, %v1649_v32  ;;  %v713_v55 = vadd.f32 %v712_v51, %v1649_v32 }
  0xfe   : > { %v653_v56 = vadd.f32 %v652_v52, %v1649_v32  ;;  %v673_v57 = vadd.f32 %v672_v53, %v1649_v32 }
  0xff   : > { %v1043_v58 = vmax.f32 %v693_v54, 0.0  ;;  %v1044_v61 = vmax.f32 %v713_v55, 0.0 }
 0x100   : > { %v1041_v59 = vmax.f32 %v653_v56, 0.0  ;;  %v1042_v60 = vmax.f32 %v673_v57, 0.0 }
 0x101   : > { %1069 = vst [vmem:[%s1656_s11 + $0x40] sm:$0xff] %v1043_v58 }
 0x102   : > { %1067 = vst [vmem:[%s1656_s11 + $0x30] sm:$0xff] %v1041_v59 }
 0x103   : > { %1068 = vst [vmem:[%s1656_s11 + $0x38] sm:$0xff] %v1042_v60 }
 0x104   : > { %1070 = vst [vmem:[%s1656_s11 + $0x48] sm:$0xff] %v1044_v61  ;;  %v772_v62 = vpop.f32.mrf.mxu0  ;;  %v792_v63 = vpop.f32.mrf.mxu1 }
 0x105   : > { %v732_v0 = vpop.f32.mrf.mxu2  ;;  %v752_v1 = vpop.f32.mrf.mxu3  ;;  %v773_v2 = vadd.f32 %v772_v62, %v1649_v32  ;;  %v793_v3 = vadd.f32 %v792_v63, %v1649_v32 }
 0x106   : > { %v733_v4 = vadd.f32 %v732_v0, %v1649_v32  ;;  %v753_v5 = vadd.f32 %v752_v1, %v1649_v32 }
 0x107   : > { %v1047_v6 = vmax.f32 %v773_v2, 0.0  ;;  %v1048_v9 = vmax.f32 %v793_v3, 0.0 }
 0x108   : > { %v1045_v7 = vmax.f32 %v733_v4, 0.0  ;;  %v1046_v8 = vmax.f32 %v753_v5, 0.0 }
 0x109   : > { %1073 = vst [vmem:[%s1656_s11 + $0x60] sm:$0xff] %v1047_v6 }
 0x10a   : > { %1071 = vst [vmem:[%s1656_s11 + $0x50] sm:$0xff] %v1045_v7 }
 0x10b   : > { %1072 = vst [vmem:[%s1656_s11 + $0x58] sm:$0xff] %v1046_v8 }
 0x10c   : > { %1074 = vst [vmem:[%s1656_s11 + $0x68] sm:$0xff] %v1048_v9  ;;  %v852_v10 = vpop.f32.mrf.mxu0  ;;  %v872_v11 = vpop.f32.mrf.mxu1 }
 0x10d   : > { %v812_v12 = vpop.f32.mrf.mxu2  ;;  %v832_v13 = vpop.f32.mrf.mxu3  ;;  %v853_v14 = vadd.f32 %v852_v10, %v1649_v32  ;;  %v873_v15 = vadd.f32 %v872_v11, %v1649_v32 }
 0x10e   : > { %v813_v16 = vadd.f32 %v812_v12, %v1649_v32  ;;  %v833_v17 = vadd.f32 %v832_v13, %v1649_v32 }
 0x10f   : > { %v1051_v18 = vmax.f32 %v853_v14, 0.0  ;;  %v1052_v21 = vmax.f32 %v873_v15, 0.0 }
 0x110   : > { %v1049_v19 = vmax.f32 %v813_v16, 0.0  ;;  %v1050_v20 = vmax.f32 %v833_v17, 0.0 }
 0x111   : > { %1077 = vst [vmem:[%s1656_s11 + $0x80] sm:$0xff] %v1051_v18 }
 0x112   : > { %1075 = vst [vmem:[%s1656_s11 + $0x70] sm:$0xff] %v1049_v19 }
 0x113   : > { %1076 = vst [vmem:[%s1656_s11 + $0x78] sm:$0xff] %v1050_v20 }
 0x114   : > { %1078 = vst [vmem:[%s1656_s11 + $0x88] sm:$0xff] %v1052_v21  ;;  %v932_v22 = vpop.f32.mrf.mxu0  ;;  %v952_v23 = vpop.f32.mrf.mxu1 }
 0x115   : > { %v892_v24 = vpop.f32.mrf.mxu2  ;;  %v912_v25 = vpop.f32.mrf.mxu3  ;;  %v933_v27 = vadd.f32 %v932_v22, %v1649_v32  ;;  %v953_v28 = vadd.f32 %v952_v23, %v1649_v32 }
 0x116   : > { %v893_v29 = vadd.f32 %v892_v24, %v1649_v32  ;;  %v913_v30 = vadd.f32 %v912_v25, %v1649_v32 }
 0x117   : > { %v1055_v31 = vmax.f32 %v933_v27, 0.0  ;;  %v1056_v35 = vmax.f32 %v953_v28, 0.0 }
 0x118   : > { %v1053_v33 = vmax.f32 %v893_v29, 0.0  ;;  %v1054_v34 = vmax.f32 %v913_v30, 0.0 }
 0x119   : > { %1081 = vst [vmem:[%s1656_s11 + $0xa0] sm:$0xff] %v1055_v31 }
 0x11a   : > { %1079 = vst [vmem:[%s1656_s11 + $0x90] sm:$0xff] %v1053_v33 }
 0x11b   : > { %1080 = vst [vmem:[%s1656_s11 + $0x98] sm:$0xff] %v1054_v34 }
 0x11c   : > { %1082 = vst [vmem:[%s1656_s11 + $0xa8] sm:$0xff] %v1056_v35  ;;  %v1012_v36 = vpop.f32.mrf.mxu0  ;;  %v1032_v26 = vpop.f32.mrf.mxu1 }
 0x11d   : > { %v972_v37 = vpop.f32.mrf.mxu2  ;;  %v992_v38 = vpop.f32.mrf.mxu3  ;;  %v1013_v39 = vadd.f32 %v1012_v36, %v1649_v32  ;;  %v1033_v40 = vadd.f32 %v1032_v26, %v1649_v32 }
 0x11e   : > { %v973_v41 = vadd.f32 %v972_v37, %v1649_v32  ;;  %v993_v42 = vadd.f32 %v992_v38, %v1649_v32 }
 0x11f   : > { %v1059_v43 = vmax.f32 %v1013_v39, 0.0  ;;  %v1060_v46 = vmax.f32 %v1033_v40, 0.0 }
 0x120   : > { %v1057_v44 = vmax.f32 %v973_v41, 0.0  ;;  %v1058_v45 = vmax.f32 %v993_v42, 0.0 }
 0x121   : > { %1085 = vst [vmem:[%s1656_s11 + $0xc0] sm:$0xff] %v1059_v43 }
 0x122   : > { %1083 = vst [vmem:[%s1656_s11 + $0xb0] sm:$0xff] %v1057_v44 }
 0x123   : > { %1084 = vst [vmem:[%s1656_s11 + $0xb8] sm:$0xff] %v1058_v45 }
 0x124   : > { %1086 = vst [vmem:[%s1656_s11 + $0xc8] sm:$0xff] %v1060_v46 }
 0x125 PF: > { %p10_p9 = scmp.ge.s32.totalorder %s1301_s16, 4   ;;  %s1722_s12 = smov %s1257_s13 }
 0x126   : > { %s1723_s13 = smov %s1310_s19  ;;  %s1724_s14 = smov %s1301_s16 }
 0x127   :  { %12 = sbr.rel (!%p10_p9) target bundleno = 2 (0x2), region = 90 }

// kernel: _encoder_forward_impl.3
= control target key start
LH: loop header
LB: loop body
LE: loop exit
PB: predicated region body
PF: predicated region fallthrough
CT: control target
= control target key end

     0   :  { %s810_s12 = smov 0   ;;  %s812_s13 = smov 0   ;;  %s1170_s0 = inlined_call_operand.vmem [shape: f32[8,100], index: 0, kind: input, shape index: {}]   ;;  %s1171_s1 = inlined_call_operand.vmem [shape: f32[100,1734], index: 1, kind: input, shape index: {}]   ;;  %s1172_s2 = inlined_call_operand.vmem [shape: f32[8,1], index: 2, kind: input, shape index: {}]   ;;  %s1173_s3 = inlined_call_operand.vmem [shape: f32[8,1734], index: 3, kind: output, shape index: {}]  }
   0x1   :  { %s814_s14 = smov 0  }
   0x2 LB: > { %s713_s15 = sadd.s32 4294967295, %s787_s14   ;;  %s827_s16 = sadd.s32 1, %s787_s14   ;;  %s787_s14 = sphi %s814_s14, %s1176_s14   ;;  %s783_s13 = sphi %s812_s13, %s1175_s13   ;;  %s779_s12 = sphi %s810_s12, %s1174_s12  }
   0x3   : > { %s38_s17 = ssub.s32 %s787_s14, %s827_s16  ;;  %s41_s18 = sadd.s32 1, %s783_s13 }
   0x4   : > { %p39_p0 = scmp.eq.s32.totalorder %s38_s17, 0  ;;  %p48_p1 = scmp.ne.s32.totalorder %s783_s13, %s779_s12 }
   0x5   : > { %p49_p2 = scmp.eq.s32.totalorder %s787_s14, 0  ;;  %p716_p4 = scmp.ge.s32.totalorder %s787_s14, 2 }
   0x6   : > { %s836_s19 = scalar_select %p39_p0, %s783_s13, %s41_s18  }
   0x7   : > { %p50_p3 = por %p49_p2, %p48_p1  ;;  %127 = sbr.rel (%p716_p4) target bundleno = 108 (0x6c), region = 24 }
   0xc   : > { %130 = sbr.rel (!%p50_p3) target bundleno = 108 (0x6c), region = 28  ;;  %s132_s20 = sand.u32 (%p50_p3), 1, %s783_s13  }
   0xd   : > { %s736_s21 = smul.u32 (%p50_p3), 56, %s787_s14 }
   0xe   : > { %s737_s22 = smul.u32 (%p50_p3), 728, %s132_s20 }
   0xf   : > { %s844_s25 = scalar_lea.vmem (%p50_p3), %s1171_s1, %s736_s21 }
  0x10   : > { %v150_v0 = vld [vmem:[%s844_s25] sm:$0xff] (%p50_p3)  ;;  %v152_v1 = vld [vmem:[%s844_s25 + $0x8] sm:$0xff] (%p50_p3)  ;;  %v154_v2 = vld [vmem:[%s844_s25 + $0x10] sm:$0xff] (%p50_p3)  ;;  %s849_s26 = scalar_lea.vmem (%p50_p3), [#allocation2], %s737_s22 }
  0x11   : > { %151 = vst [vmem:[%s849_s26] sm:$0xff] %v150_v0  ;;  %v156_v3 = vld [vmem:[%s844_s25 + $0x18] sm:$0xff]  ;;  %v158_v4 = vld [vmem:[%s844_s25 + $0x20] sm:$0xff]  ;;  %v160_v5 = vld [vmem:[%s844_s25 + $0x28] sm:$0xff] }
  0x12   : > { %153 = vst [vmem:[%s849_s26 + $0x8] sm:$0xff] %v152_v1  ;;  %v162_v6 = vld [vmem:[%s844_s25 + $0x30] sm:$0xff]  ;;  %v166_v8 = vld [vmem:[%s844_s25 + $0x78] sm:$0xff]  ;;  %v168_v9 = vld [vmem:[%s844_s25 + $0x80] sm:$0xff] }
  0x13   : > { %155 = vst [vmem:[%s849_s26 + $0x10] sm:$0xff] %v154_v2  ;;  %v164_v7 = vld [vmem:[%s844_s25 + $0x70] sm:$0xff]  ;;  %v170_v10 = vld [vmem:[%s844_s25 + $0x88] sm:$0xff]  ;;  %v174_v12 = vld [vmem:[%s844_s25 + $0x98] sm:$0xff] }
  0x14   : > { %157 = vst [vmem:[%s849_s26 + $0x18] sm:$0xff] %v156_v3  ;;  %v172_v11 = vld [vmem:[%s844_s25 + $0x90] sm:$0xff]  ;;  %v176_v13 = vld [vmem:[%s844_s25 + $0xa0] sm:$0xff]  ;;  %v180_v15 = vld [vmem:[%s844_s25 + $0xe8] sm:$0xff] }
  0x15   : > { %159 = vst [vmem:[%s849_s26 + $0x20] sm:$0xff] %v158_v4  ;;  %v178_v14 = vld [vmem:[%s844_s25 + $0xe0] sm:$0xff]  ;;  %v182_v16 = vld [vmem:[%s844_s25 + $0xf0] sm:$0xff]  ;;  %v184_v17 = vld [vmem:[%s844_s25 + $0xf8] sm:$0xff] }
  0x16   : > { %161 = vst [vmem:[%s849_s26 + $0x28] sm:$0xff] %v160_v5  ;;  %v186_v18 = vld [vmem:[%s844_s25 + $0x100] sm:$0xff]  ;;  %v188_v19 = vld [vmem:[%s844_s25 + $0x108] sm:$0xff]  ;;  %v190_v20 = vld [vmem:[%s844_s25 + $0x110] sm:$0xff] }
  0x17   : > { %163 = vst [vmem:[%s849_s26 + $0x30] sm:$0xff] %v162_v6  ;;  %v192_v21 = vld [vmem:[%s844_s25 + $0x150] sm:$0xff]  ;;  %v194_v22 = vld [vmem:[%s844_s25 + $0x158] sm:$0xff]  ;;  %v196_v23 = vld [vmem:[%s844_s25 + $0x160] sm:$0xff] }
  0x18   : > { %165 = vst [vmem:[%s849_s26 + $0x38] sm:$0xff] %v164_v7  ;;  %v198_v24 = vld [vmem:[%s844_s25 + $0x168] sm:$0xff]  ;;  %v200_v25 = vld [vmem:[%s844_s25 + $0x170] sm:$0xff]  ;;  %v202_v26 = vld [vmem:[%s844_s25 + $0x178] sm:$0xff] }
  0x19   : > { %167 = vst [vmem:[%s849_s26 + $0x40] sm:$0xff] %v166_v8  ;;  %v204_v27 = vld [vmem:[%s844_s25 + $0x180] sm:$0xff]  ;;  %v208_v29 = vld [vmem:[%s844_s25 + $0x1c8] sm:$0xff]  ;;  %v210_v30 = vld [vmem:[%s844_s25 + $0x1d0] sm:$0xff] }
  0x1a   : > { %169 = vst [vmem:[%s849_s26 + $0x48] sm:$0xff] %v168_v9  ;;  %v206_v28 = vld [vmem:[%s844_s25 + $0x1c0] sm:$0xff]  ;;  %v212_v31 = vld [vmem:[%s844_s25 + $0x1d8] sm:$0xff]  ;;  %v216_v33 = vld [vmem:[%s844_s25 + $0x1e8] sm:$0xff] }
  0x1b   : > { %171 = vst [vmem:[%s849_s26 + $0x50] sm:$0xff] %v170_v10  ;;  %v214_v32 = vld [vmem:[%s844_s25 + $0x1e0] sm:$0xff]  ;;  %v218_v34 = vld [vmem:[%s844_s25 + $0x1f0] sm:$0xff]  ;;  %v222_v36 = vld [vmem:[%s844_s25 + $0x238] sm:$0xff] }
  0x1c   : > { %173 = vst [vmem:[%s849_s26 + $0x58] sm:$0xff] %v172_v11  ;;  %v220_v35 = vld [vmem:[%s844_s25 + $0x230] sm:$0xff]  ;;  %v224_v37 = vld [vmem:[%s844_s25 + $0x240] sm:$0xff]  ;;  %v226_v38 = vld [vmem:[%s844_s25 + $0x248] sm:$0xff] }
  0x1d   : > { %175 = vst [vmem:[%s849_s26 + $0x60] sm:$0xff] %v174_v12  ;;  %v228_v39 = vld [vmem:[%s844_s25 + $0x250] sm:$0xff]  ;;  %v230_v40 = vld [vmem:[%s844_s25 + $0x258] sm:$0xff]  ;;  %v232_v41 = vld [vmem:[%s844_s25 + $0x260] sm:$0xff] }
  0x1e   : > { %177 = vst [vmem:[%s849_s26 + $0x68] sm:$0xff] %v176_v13  ;;  %v234_v42 = vld [vmem:[%s844_s25 + $0x2a0] sm:$0xff]  ;;  %v236_v43 = vld [vmem:[%s844_s25 + $0x2a8] sm:$0xff]  ;;  %v238_v44 = vld [vmem:[%s844_s25 + $0x2b0] sm:$0xff] }
  0x1f   : > { %179 = vst [vmem:[%s849_s26 + $0x70] sm:$0xff] %v178_v14  ;;  %v240_v45 = vld [vmem:[%s844_s25 + $0x2b8] sm:$0xff]  ;;  %v242_v46 = vld [vmem:[%s844_s25 + $0x2c0] sm:$0xff]  ;;  %v244_v47 = vld [vmem:[%s844_s25 + $0x2c8] sm:$0xff] }
  0x20   : > { %181 = vst [vmem:[%s849_s26 + $0x78] sm:$0xff] %v180_v15  ;;  %v246_v48 = vld [vmem:[%s844_s25 + $0x2d0] sm:$0xff]  ;;  %v250_v50 = vld [vmem:[%s844_s25 + $0x318] sm:$0xff]  ;;  %v252_v51 = vld [vmem:[%s844_s25 + $0x320] sm:$0xff] }
  0x21   : > { %183 = vst [vmem:[%s849_s26 + $0x80] sm:$0xff] %v182_v16  ;;  %v248_v49 = vld [vmem:[%s844_s25 + $0x310] sm:$0xff]  ;;  %v254_v52 = vld [vmem:[%s844_s25 + $0x328] sm:$0xff]  ;;  %v258_v54 = vld [vmem:[%s844_s25 + $0x338] sm:$0xff] }
  0x22   : > { %185 = vst [vmem:[%s849_s26 + $0x88] sm:$0xff] %v184_v17  ;;  %v256_v53 = vld [vmem:[%s844_s25 + $0x330] sm:$0xff]  ;;  %v260_v55 = vld [vmem:[%s844_s25 + $0x340] sm:$0xff]  ;;  %v264_v57 = vld [vmem:[%s844_s25 + $0x388] sm:$0xff] }
  0x23   : > { %187 = vst [vmem:[%s849_s26 + $0x90] sm:$0xff] %v186_v18  ;;  %v262_v56 = vld [vmem:[%s844_s25 + $0x380] sm:$0xff]  ;;  %v266_v58 = vld [vmem:[%s844_s25 + $0x390] sm:$0xff]  ;;  %v268_v59 = vld [vmem:[%s844_s25 + $0x398] sm:$0xff] }
  0x24   : > { %189 = vst [vmem:[%s849_s26 + $0x98] sm:$0xff] %v188_v19  ;;  %v270_v60 = vld [vmem:[%s844_s25 + $0x3a0] sm:$0xff]  ;;  %v272_v61 = vld [vmem:[%s844_s25 + $0x3a8] sm:$0xff]  ;;  %v274_v62 = vld [vmem:[%s844_s25 + $0x3b0] sm:$0xff] }
  0x25   : > { %191 = vst [vmem:[%s849_s26 + $0xa0] sm:$0xff] %v190_v20  ;;  %v276_v63 = vld [vmem:[%s844_s25 + $0x3f0] sm:$0xff]  ;;  %v278_v0 = vld [vmem:[%s844_s25 + $0x3f8] sm:$0xff]  ;;  %v280_v1 = vld [vmem:[%s844_s25 + $0x400] sm:$0xff] }
  0x26   : > { %193 = vst [vmem:[%s849_s26 + $0xa8] sm:$0xff] %v192_v21  ;;  %v282_v2 = vld [vmem:[%s844_s25 + $0x408] sm:$0xff]  ;;  %v284_v3 = vld [vmem:[%s844_s25 + $0x410] sm:$0xff]  ;;  %v286_v4 = vld [vmem:[%s844_s25 + $0x418] sm:$0xff] }
  0x27   : > { %195 = vst [vmem:[%s849_s26 + $0xb0] sm:$0xff] %v194_v22  ;;  %v288_v5 = vld [vmem:[%s844_s25 + $0x420] sm:$0xff]  ;;  %v292_v7 = vld [vmem:[%s844_s25 + $0x468] sm:$0xff]  ;;  %v294_v8 = vld [vmem:[%s844_s25 + $0x470] sm:$0xff] }
  0x28   : > { %197 = vst [vmem:[%s849_s26 + $0xb8] sm:$0xff] %v196_v23  ;;  %v290_v6 = vld [vmem:[%s844_s25 + $0x460] sm:$0xff]  ;;  %v296_v9 = vld [vmem:[%s844_s25 + $0x478] sm:$0xff]  ;;  %v300_v11 = vld [vmem:[%s844_s25 + $0x488] sm:$0xff] }
  0x29   : > { %199 = vst [vmem:[%s849_s26 + $0xc0] sm:$0xff] %v198_v24  ;;  %v298_v10 = vld [vmem:[%s844_s25 + $0x480] sm:$0xff]  ;;  %v302_v12 = vld [vmem:[%s844_s25 + $0x490] sm:$0xff]  ;;  %v306_v14 = vld [vmem:[%s844_s25 + $0x4d8] sm:$0xff] }
  0x2a   : > { %201 = vst [vmem:[%s849_s26 + $0xc8] sm:$0xff] %v200_v25  ;;  %v304_v13 = vld [vmem:[%s844_s25 + $0x4d0] sm:$0xff]  ;;  %v308_v15 = vld [vmem:[%s844_s25 + $0x4e0] sm:$0xff]  ;;  %v310_v16 = vld [vmem:[%s844_s25 + $0x4e8] sm:$0xff] }
  0x2b   : > { %203 = vst [vmem:[%s849_s26 + $0xd0] sm:$0xff] %v202_v26  ;;  %v312_v17 = vld [vmem:[%s844_s25 + $0x4f0] sm:$0xff]  ;;  %v314_v18 = vld [vmem:[%s844_s25 + $0x4f8] sm:$0xff]  ;;  %v316_v19 = vld [vmem:[%s844_s25 + $0x500] sm:$0xff] }
  0x2c   : > { %205 = vst [vmem:[%s849_s26 + $0xd8] sm:$0xff] %v204_v27  ;;  %v318_v20 = vld [vmem:[%s844_s25 + $0x540] sm:$0xff]  ;;  %v320_v21 = vld [vmem:[%s844_s25 + $0x548] sm:$0xff]  ;;  %v322_v22 = vld [vmem:[%s844_s25 + $0x550] sm:$0xff] }
  0x2d   : > { %207 = vst [vmem:[%s849_s26 + $0xe0] sm:$0xff] %v206_v28  ;;  %v324_v23 = vld [vmem:[%s844_s25 + $0x558] sm:$0xff]  ;;  %v326_v24 = vld [vmem:[%s844_s25 + $0x560] sm:$0xff]  ;;  %v328_v25 = vld [vmem:[%s844_s25 + $0x568] sm:$0xff] }
  0x2e   : > { %209 = vst [vmem:[%s849_s26 + $0xe8] sm:$0xff] %v208_v29  ;;  %v330_v26 = vld [vmem:[%s844_s25 + $0x570] sm:$0xff] }
  0x2f   : > { %211 = vst [vmem:[%s849_s26 + $0xf0] sm:$0xff] %v210_v30 }
  0x30   : > { %213 = vst [vmem:[%s849_s26 + $0xf8] sm:$0xff] %v212_v31 }
  0x31   : > { %215 = vst [vmem:[%s849_s26 + $0x100] sm:$0xff] %v214_v32 }
  0x32   : > { %217 = vst [vmem:[%s849_s26 + $0x108] sm:$0xff] %v216_v33 }
  0x33   : > { %219 = vst [vmem:[%s849_s26 + $0x110] sm:$0xff] %v218_v34 }
  0x34   : > { %221 = vst [vmem:[%s849_s26 + $0x118] sm:$0xff] %v220_v35 }
  0x35   : > { %223 = vst [vmem:[%s849_s26 + $0x120] sm:$0xff] %v222_v36 }
  0x36   : > { %225 = vst [vmem:[%s849_s26 + $0x128] sm:$0xff] %v224_v37 }
  0x37   : > { %227 = vst [vmem:[%s849_s26 + $0x130] sm:$0xff] %v226_v38 }
  0x38   : > { %229 = vst [vmem:[%s849_s26 + $0x138] sm:$0xff] %v228_v39 }
  0x39   : > { %231 = vst [vmem:[%s849_s26 + $0x140] sm:$0xff] %v230_v40 }
  0x3a   : > { %233 = vst [vmem:[%s849_s26 + $0x148] sm:$0xff] %v232_v41 }
  0x3b   : > { %235 = vst [vmem:[%s849_s26 + $0x150] sm:$0xff] %v234_v42 }
  0x3c   : > { %237 = vst [vmem:[%s849_s26 + $0x158] sm:$0xff] %v236_v43 }
  0x3d   : > { %239 = vst [vmem:[%s849_s26 + $0x160] sm:$0xff] %v238_v44 }
  0x3e   : > { %241 = vst [vmem:[%s849_s26 + $0x168] sm:$0xff] %v240_v45 }
  0x3f   : > { %243 = vst [vmem:[%s849_s26 + $0x170] sm:$0xff] %v242_v46 }
  0x40   : > { %245 = vst [vmem:[%s849_s26 + $0x178] sm:$0xff] %v244_v47 }
  0x41   : > { %247 = vst [vmem:[%s849_s26 + $0x180] sm:$0xff] %v246_v48 }
  0x42   : > { %249 = vst [vmem:[%s849_s26 + $0x188] sm:$0xff] %v248_v49 }
  0x43   : > { %251 = vst [vmem:[%s849_s26 + $0x190] sm:$0xff] %v250_v50 }
  0x44   : > { %253 = vst [vmem:[%s849_s26 + $0x198] sm:$0xff] %v252_v51 }
  0x45   : > { %255 = vst [vmem:[%s849_s26 + $0x1a0] sm:$0xff] %v254_v52 }
  0x46   : > { %257 = vst [vmem:[%s849_s26 + $0x1a8] sm:$0xff] %v256_v53 }
  0x47   : > { %259 = vst [vmem:[%s849_s26 + $0x1b0] sm:$0xff] %v258_v54 }
  0x48   : > { %261 = vst [vmem:[%s849_s26 + $0x1b8] sm:$0xff] %v260_v55 }
  0x49   : > { %263 = vst [vmem:[%s849_s26 + $0x1c0] sm:$0xff] %v262_v56 }
  0x4a   : > { %265 = vst [vmem:[%s849_s26 + $0x1c8] sm:$0xff] %v264_v57 }
  0x4b   : > { %267 = vst [vmem:[%s849_s26 + $0x1d0] sm:$0xff] %v266_v58 }
  0x4c   : > { %269 = vst [vmem:[%s849_s26 + $0x1d8] sm:$0xff] %v268_v59 }
  0x4d   : > { %271 = vst [vmem:[%s849_s26 + $0x1e0] sm:$0xff] %v270_v60 }
  0x4e   : > { %273 = vst [vmem:[%s849_s26 + $0x1e8] sm:$0xff] %v272_v61 }
  0x4f   : > { %275 = vst [vmem:[%s849_s26 + $0x1f0] sm:$0xff] %v274_v62 }
  0x50   : > { %277 = vst [vmem:[%s849_s26 + $0x1f8] sm:$0xff] %v276_v63 }
  0x51   : > { %279 = vst [vmem:[%s849_s26 + $0x200] sm:$0xff] %v278_v0 }
  0x52   : > { %281 = vst [vmem:[%s849_s26 + $0x208] sm:$0xff] %v280_v1 }
  0x53   : > { %283 = vst [vmem:[%s849_s26 + $0x210] sm:$0xff] %v282_v2 }
  0x54   : > { %285 = vst [vmem:[%s849_s26 + $0x218] sm:$0xff] %v284_v3 }
  0x55   : > { %287 = vst [vmem:[%s849_s26 + $0x220] sm:$0xff] %v286_v4 }
  0x56   : > { %289 = vst [vmem:[%s849_s26 + $0x228] sm:$0xff] %v288_v5 }
  0x57   : > { %291 = vst [vmem:[%s849_s26 + $0x230] sm:$0xff] %v290_v6 }
  0x58   : > { %293 = vst [vmem:[%s849_s26 + $0x238] sm:$0xff] %v292_v7 }
  0x59   : > { %295 = vst [vmem:[%s849_s26 + $0x240] sm:$0xff] %v294_v8 }
  0x5a   : > { %297 = vst [vmem:[%s849_s26 + $0x248] sm:$0xff] %v296_v9 }
  0x5b   : > { %299 = vst [vmem:[%s849_s26 + $0x250] sm:$0xff] %v298_v10 }
  0x5c   : > { %301 = vst [vmem:[%s849_s26 + $0x258] sm:$0xff] %v300_v11 }
  0x5d   : > { %303 = vst [vmem:[%s849_s26 + $0x260] sm:$0xff] %v302_v12 }
  0x5e   : > { %305 = vst [vmem:[%s849_s26 + $0x268] sm:$0xff] %v304_v13 }
  0x5f   : > { %307 = vst [vmem:[%s849_s26 + $0x270] sm:$0xff] %v306_v14 }
  0x60   : > { %309 = vst [vmem:[%s849_s26 + $0x278] sm:$0xff] %v308_v15 }
  0x61   : > { %311 = vst [vmem:[%s849_s26 + $0x280] sm:$0xff] %v310_v16 }
  0x62   : > { %313 = vst [vmem:[%s849_s26 + $0x288] sm:$0xff] %v312_v17 }
  0x63   : > { %315 = vst [vmem:[%s849_s26 + $0x290] sm:$0xff] %v314_v18 }
  0x64   : > { %317 = vst [vmem:[%s849_s26 + $0x298] sm:$0xff] %v316_v19 }
  0x65   : > { %319 = vst [vmem:[%s849_s26 + $0x2a0] sm:$0xff] %v318_v20 }
  0x66   : > { %321 = vst [vmem:[%s849_s26 + $0x2a8] sm:$0xff] %v320_v21 }
  0x67   : > { %323 = vst [vmem:[%s849_s26 + $0x2b0] sm:$0xff] %v322_v22 }
  0x68   : > { %325 = vst [vmem:[%s849_s26 + $0x2b8] sm:$0xff] %v324_v23 }
  0x69   : > { %327 = vst [vmem:[%s849_s26 + $0x2c0] sm:$0xff] %v326_v24 }
  0x6a   : > { %329 = vst [vmem:[%s849_s26 + $0x2c8] sm:$0xff] %v328_v25 }
  0x6b   : > { %331 = vst [vmem:[%s849_s26 + $0x2d0] sm:$0xff] %v330_v26 }
  0x6c PF: > { %p718_p5 = scmp.ge.s32.totalorder %s787_s14, 1  ;;  %p336_p6 = scmp.lt.s32.totalorder %s787_s14, 3 }
  0x6e   : > { %p337_p7 = pnand %p718_p5, %p336_p6 }
  0x6f   : > { %s343_s27 = sand.u32 (!%p337_p7), 1, %s779_s12   ;;  %s367_s7 = smul.u32 (!%p337_p7), 7, %s713_s15 }
  0x70   : > { %340 = sbr.rel (%p337_p7) target bundleno = 306 (0x132), region = 51 }
  0x71   : > { %s738_s28 = smul.u32 (!%p337_p7), 728, %s343_s27  ;;  %p368_p8 = scmp.lt.s32.totalorder (!%p337_p7), %s367_s7, 13 }
  0x73   : > { %s1033_s29 = scalar_lea.vmem (!%p337_p7), [#allocation2], %s738_s28 }
  0x75   : > { %vm475_vm0 = vcmask 1043456   ;;  %v460_v27 = vld [vmem:[%s1033_s29 + $0x2b0] sm:$0xf]  ;;  %v453_v28 = vld [vmem:[%s1033_s29 + $0x278] sm:$0xff]  ;;  %v458_v29 = vld [vmem:[%s1033_s29 + $0x2a0] sm:$0xf] }
  0x76   : > { %724 = vmatpush.msk.msra.mxu2 %vm475_vm0, %v460_v27  ;;  %v459_v30 = vld [vmem:[%s1033_s29 + $0x2a8] sm:$0xf]  ;;  %v446_v31 = vld [vmem:[%s1033_s29 + $0x240] sm:$0xff]  ;;  %720 = vmatpush.msk.msra.mxu0 %vm475_vm0, %v458_v29  ;;  %v452_v33 = vld [vmem:[%s1033_s29 + $0x270] sm:$0xff]  ;;  %vm471_vm1 = vcmask 818176   ;;  %s1178_s7 = smov (!%p368_p8, %s367_s7), 13 }
  0x77   : > { %722 = vmatpush.msk.msra.mxu1 %vm475_vm0, %v459_v30  ;;  %v451_v32 = vld [vmem:[%s1033_s29 + $0x268] sm:$0xff]  ;;  %v444_v34 = vld [vmem:[%s1033_s29 + $0x230] sm:$0xff]  ;;  %v445_v35 = vld [vmem:[%s1033_s29 + $0x238] sm:$0xff]  ;;  %s719_s8 = sshll.u32 %s1178_s7, 3 }
  0x78   : > { %541 = vmatpush.msra.mxu2 %v453_v28  ;;  %v439_v36 = vld [vmem:[%s1033_s29 + $0x208] sm:$0xff]  ;;  %501 = vmatpush.msra.mxu0 %v451_v32  ;;  %v437_v37 = vld [vmem:[%s1033_s29 + $0x1f8] sm:$0xff]  ;;  %v438_v38 = vld [vmem:[%s1033_s29 + $0x200] sm:$0xff]  ;;  %s371_s11 = scalar_lea.vmem %s1173_s3, %s719_s8 }
  0x79   : > { %521 = vmatpush.msra.mxu1 %v452_v33  ;;  %v432_v39 = vld [vmem:[%s1033_s29 + $0x1d0] sm:$0xff]  ;;  %v430_v40 = vld [vmem:[%s1033_s29 + $0x1c0] sm:$0xff]  ;;  %v431_v41 = vld [vmem:[%s1033_s29 + $0x1c8] sm:$0xff] }
  0x7a   : > { %542 = vmatpush.msra.mxu2 %v446_v31  ;;  %502 = vmatpush.msra.mxu0 %v444_v34  ;;  %v425_v42 = vld [vmem:[%s1033_s29 + $0x198] sm:$0xff]  ;;  %v423_v43 = vld [vmem:[%s1033_s29 + $0x188] sm:$0xff]  ;;  %v424_v44 = vld [vmem:[%s1033_s29 + $0x190] sm:$0xff] }
  0x7b   : > { %522 = vmatpush.msra.mxu1 %v445_v35  ;;  %v418_v45 = vld [vmem:[%s1033_s29 + $0x160] sm:$0xff]  ;;  %v416_v46 = vld [vmem:[%s1033_s29 + $0x150] sm:$0xff]  ;;  %v417_v47 = vld [vmem:[%s1033_s29 + $0x158] sm:$0xff] }
  0x7c   : > { %543 = vmatpush.msra.mxu2 %v439_v36  ;;  %503 = vmatpush.msra.mxu0 %v437_v37  ;;  %v461_v48 = vld [vmem:[%s1033_s29 + $0x2b8] sm:$0xf]  ;;  %v411_v49 = vld [vmem:[%s1033_s29 + $0x128] sm:$0xff]  ;;  %v454_v50 = vld [vmem:[%s1033_s29 + $0x280] sm:$0xff] }
  0x7d   : > { %523 = vmatpush.msra.mxu1 %v438_v38  ;;  %v409_v51 = vld [vmem:[%s1033_s29 + $0x118] sm:$0xff]  ;;  %v410_v52 = vld [vmem:[%s1033_s29 + $0x120] sm:$0xff]  ;;  %726 = vmatpush.msk.msra.mxu3 %vm475_vm0, %v461_v48  ;;  %v404_v53 = vld [vmem:[%s1033_s29 + $0xf0] sm:$0xff] }
  0x7e   : > { %544 = vmatpush.msra.mxu2 %v432_v39  ;;  %504 = vmatpush.msra.mxu0 %v430_v40  ;;  %v447_v54 = vld [vmem:[%s1033_s29 + $0x248] sm:$0xff]  ;;  %v402_v55 = vld [vmem:[%s1033_s29 + $0xe0] sm:$0xff]  ;;  %v397_v57 = vld [vmem:[%s1033_s29 + $0xb8] sm:$0xff] }
  0x7f   : > { %524 = vmatpush.msra.mxu1 %v431_v41  ;;  %v403_v56 = vld [vmem:[%s1033_s29 + $0xe8] sm:$0xff]  ;;  %561 = vmatpush.msra.mxu3 %v454_v50  ;;  %v440_v58 = vld [vmem:[%s1033_s29 + $0x210] sm:$0xff]  ;;  %v390_v61 = vld [vmem:[%s1033_s29 + $0x80] sm:$0xff] }
  0x80   : > { %545 = vmatpush.msra.mxu2 %v425_v42  ;;  %505 = vmatpush.msra.mxu0 %v423_v43  ;;  %v395_v59 = vld [vmem:[%s1033_s29 + $0xa8] sm:$0xff]  ;;  %v396_v60 = vld [vmem:[%s1033_s29 + $0xb0] sm:$0xff]  ;;  %v433_v62 = vld [vmem:[%s1033_s29 + $0x1d8] sm:$0xff] }
  0x81   : > { %525 = vmatpush.msra.mxu1 %v424_v44  ;;  %562 = vmatpush.msra.mxu3 %v447_v54  ;;  %v388_v63 = vld [vmem:[%s1033_s29 + $0x70] sm:$0xff]  ;;  %v389_v0 = vld [vmem:[%s1033_s29 + $0x78] sm:$0xff]  ;;  %v383_v1 = vld [vmem:[%s1033_s29 + $0x48] sm:$0xff] }
  0x82   : > { %546 = vmatpush.msra.mxu2 %v418_v45  ;;  %506 = vmatpush.msra.mxu0 %v416_v46  ;;  %v426_v2 = vld [vmem:[%s1033_s29 + $0x1a0] sm:$0xff]  ;;  %v381_v3 = vld [vmem:[%s1033_s29 + $0x38] sm:$0xff]  ;;  %v376_v5 = vld [vmem:[%s1033_s29 + $0x10] sm:$0xff] }
  0x83   : > { %526 = vmatpush.msra.mxu1 %v417_v47  ;;  %563 = vmatpush.msra.mxu3 %v440_v58  ;;  %v382_v4 = vld [vmem:[%s1033_s29 + $0x40] sm:$0xff]  ;;  %v419_v6 = vld [vmem:[%s1033_s29 + $0x168] sm:$0xff]  ;;  %v464_v7 = vld [vmem:[%s1033_s29 + $0x2d0] sm:$0xf] }
  0x84   : > { %547 = vmatpush.msra.mxu2 %v411_v49  ;;  %507 = vmatpush.msra.mxu0 %v409_v51  ;;  %v374_v8 = vld [vmem:[%s1033_s29] sm:$0xff]  ;;  %v375_v9 = vld [vmem:[%s1033_s29 + $0x8] sm:$0xff]  ;;  %v457_v11 = vld [vmem:[%s1033_s29 + $0x298] sm:$0xff] }
  0x85   : > { %527 = vmatpush.msra.mxu1 %v410_v52  ;;  %564 = vmatpush.msra.mxu3 %v433_v62  ;;  %v462_v10 = vld [vmem:[%s1033_s29 + $0x2c0] sm:$0xf]  ;;  %v463_v12 = vld [vmem:[%s1033_s29 + $0x2c8] sm:$0xf]  ;;  %v412_v14 = vld [vmem:[%s1033_s29 + $0x130] sm:$0xff] }
  0x86   : > { %548 = vmatpush.msra.mxu2 %v404_v53  ;;  %508 = vmatpush.msra.mxu0 %v402_v55  ;;  %v455_v13 = vld [vmem:[%s1033_s29 + $0x288] sm:$0xff]  ;;  %v450_v15 = vld [vmem:[%s1033_s29 + $0x260] sm:$0xff]  ;;  %v456_v16 = vld [vmem:[%s1033_s29 + $0x290] sm:$0xff]  ;;  %v789_v53 = vmov 0  }
  0x87   : > { %528 = vmatpush.msra.mxu1 %v403_v56  ;;  %565 = vmatpush.msra.mxu3 %v426_v2  ;;  %v448_v17 = vld [vmem:[%s1033_s29 + $0x250] sm:$0xff]  ;;  %v405_v18 = vld [vmem:[%s1033_s29 + $0xf8] sm:$0xff]  ;;  %v443_v19 = vld [vmem:[%s1033_s29 + $0x228] sm:$0xff] }
  0x88   : > { %549 = vmatpush.msra.mxu2 %v397_v57  ;;  %509 = vmatpush.msra.mxu0 %v395_v59  ;;  %v449_v20 = vld [vmem:[%s1033_s29 + $0x258] sm:$0xff]  ;;  %v1104_v22 = vld [vmem:[%s1170_s0] sm:$0xff]  ;;  %v436_v23 = vld [vmem:[%s1033_s29 + $0x1f0] sm:$0xff] }
  0x89   : > { %529 = vmatpush.msra.mxu1 %v396_v60  ;;  %566 = vmatpush.msra.mxu3 %v419_v6  ;;  %v441_v21 = vld [vmem:[%s1033_s29 + $0x218] sm:$0xff]  ;;  %v442_v24 = vld [vmem:[%s1033_s29 + $0x220] sm:$0xff]  ;;  %v435_v28 = vld [vmem:[%s1033_s29 + $0x1e8] sm:$0xff] }
  0x8a   : > { %550 = vmatpush.msra.mxu2 %v390_v61  ;;  %510 = vmatpush.msra.mxu0 %v388_v63  ;;  %v434_v25 = vld [vmem:[%s1033_s29 + $0x1e0] sm:$0xff]  ;;  %v429_v27 = vld [vmem:[%s1033_s29 + $0x1b8] sm:$0xff]  ;;  %v427_v29 = vld [vmem:[%s1033_s29 + $0x1a8] sm:$0xff] }
  0x8b   : > { %530 = vmatpush.msra.mxu1 %v389_v0  ;;  %567 = vmatpush.msra.mxu3 %v412_v14  ;;  %v398_v26 = vld [vmem:[%s1033_s29 + $0xc0] sm:$0xff]  ;;  %v391_v30 = vld [vmem:[%s1033_s29 + $0x88] sm:$0xff]  ;;  %v428_v32 = vld [vmem:[%s1033_s29 + $0x1b0] sm:$0xff] }
  0x8c   : > { %551 = vmatpush.msra.mxu2 %v383_v1  ;;  %511 = vmatpush.msra.mxu0 %v381_v3  ;;  %v422_v31 = vld [vmem:[%s1033_s29 + $0x180] sm:$0xff]  ;;  %v420_v33 = vld [vmem:[%s1033_s29 + $0x170] sm:$0xff]  ;;  %v415_v35 = vld [vmem:[%s1033_s29 + $0x148] sm:$0xff] }
  0x8d   : > { %531 = vmatpush.msra.mxu1 %v382_v4  ;;  %568 = vmatpush.msra.mxu3 %v405_v18  ;;  %v384_v34 = vld [vmem:[%s1033_s29 + $0x50] sm:$0xff]  ;;  %v421_v36 = vld [vmem:[%s1033_s29 + $0x178] sm:$0xff]  ;;  %v414_v39 = vld [vmem:[%s1033_s29 + $0x140] sm:$0xff] }
  0x8e   : > { %552 = vmatpush.msra.mxu2 %v376_v5  ;;  %512 = vmatpush.msra.mxu0 %v374_v8  ;;  %v413_v37 = vld [vmem:[%s1033_s29 + $0x138] sm:$0xff]  ;;  %v408_v38 = vld [vmem:[%s1033_s29 + $0x110] sm:$0xff]  ;;  %v406_v40 = vld [vmem:[%s1033_s29 + $0x100] sm:$0xff] }
  0x8f   : > { %532 = vmatpush.msra.mxu1 %v375_v9  ;;  %725 = vmatmul.msk.f32.vlgmr.msra.gmra.mxu2 %vm471_vm1, %v1104_v22  ;;  %v377_v41 = vld [vmem:[%s1033_s29 + $0x18] sm:$0xff]  ;;  %v407_v43 = vld [vmem:[%s1033_s29 + $0x108] sm:$0xff]  ;;  %v394_v44 = vld [vmem:[%s1033_s29 + $0xa0] sm:$0xff] }
  0x90   : > { %732 = vmatpush.msk.msrb.mxu2 %vm475_vm0, %v464_v7  ;;  %728 = vmatpush.msk.msrb.mxu0 %vm475_vm0, %v462_v10  ;;  %v401_v42 = vld [vmem:[%s1033_s29 + $0xd8] sm:$0xff]  ;;  %v399_v45 = vld [vmem:[%s1033_s29 + $0xc8] sm:$0xff]  ;;  %v400_v46 = vld [vmem:[%s1033_s29 + $0xd0] sm:$0xff] }
  0x91   : > { %730 = vmatpush.msk.msrb.mxu1 %vm475_vm0, %v463_v12  ;;  %569 = vmatpush.msra.mxu3 %v398_v26  ;;  %v387_v47 = vld [vmem:[%s1033_s29 + $0x68] sm:$0xff]  ;;  %v392_v48 = vld [vmem:[%s1033_s29 + $0x90] sm:$0xff]  ;;  %v393_v49 = vld [vmem:[%s1033_s29 + $0x98] sm:$0xff] }
  0x92   : > { %621 = vmatpush.msrb.mxu2 %v457_v11  ;;  %581 = vmatpush.msrb.mxu0 %v455_v13  ;;  %v465_v50 = vld [vmem:[%s1172_s2] sm:$0xff]  ;;  %v380_v51 = vld [vmem:[%s1033_s29 + $0x30] sm:$0xff]  ;;  %v385_v52 = vld [vmem:[%s1033_s29 + $0x58] sm:$0xff] }
  0x93   : > { %601 = vmatpush.msrb.mxu1 %v456_v16  ;;  %570 = vmatpush.msra.mxu3 %v391_v30  ;;  %v386_v54 = vld [vmem:[%s1033_s29 + $0x60] sm:$0xff]  ;;  %v379_v56 = vld [vmem:[%s1033_s29 + $0x28] sm:$0xff] }
  0x94   : > { %622 = vmatpush.msrb.mxu2 %v450_v15  ;;  %582 = vmatpush.msrb.mxu0 %v448_v17  ;;  %v378_v55 = vld [vmem:[%s1033_s29 + $0x20] sm:$0xff] }
  0x95   : > { %602 = vmatpush.msrb.mxu1 %v449_v20  ;;  %571 = vmatpush.msra.mxu3 %v384_v34 }
  0x96   : > { %623 = vmatpush.msrb.mxu2 %v443_v19  ;;  %583 = vmatpush.msrb.mxu0 %v441_v21 }
  0x97   : > { %603 = vmatpush.msrb.mxu1 %v442_v24  ;;  %572 = vmatpush.msra.mxu3 %v377_v41 }
  0x98   : > { %624 = vmatpush.msrb.mxu2 %v436_v23  ;;  %584 = vmatpush.msrb.mxu0 %v434_v25 }
  0x99   : > { %604 = vmatpush.msrb.mxu1 %v435_v28  ;;  %721 = vmatmul.msk.f32.vlgmr.msra.gmra.mxu0 %vm471_vm1, %v1104_v22 }
  0x9a   : > { %625 = vmatpush.msrb.mxu2 %v429_v27  ;;  %585 = vmatpush.msrb.mxu0 %v427_v29 }
  0x9b   : > { %605 = vmatpush.msrb.mxu1 %v428_v32  ;;  %727 = vmatmul.msk.f32.vlgmr.msra.gmra.mxu3 %vm471_vm1, %v1104_v22 }
  0x9c   : > { %626 = vmatpush.msrb.mxu2 %v422_v31  ;;  %586 = vmatpush.msrb.mxu0 %v420_v33 }
  0x9d   : > { %606 = vmatpush.msrb.mxu1 %v421_v36  ;;  %764 = vset.pattern.permute.xlu0 %v789_v53 }
  0x9e   : > { %627 = vmatpush.msrb.mxu2 %v415_v35  ;;  %587 = vmatpush.msrb.mxu0 %v413_v37 }
  0x9f   : > { %723 = vmatmul.msk.f32.vlgmr.msra.gmra.mxu1 %vm471_vm1, %v1104_v22  ;;  %468 = vperm.xlu0 %764, %v465_v50  }
  0xa0   : > { %628 = vmatpush.msrb.mxu2 %v408_v38  ;;  %607 = vmatpush.msrb.mxu1 %v414_v39 }
  0xa1   : > { %588 = vmatpush.msrb.mxu0 %v406_v40 }
  0xa2   : > { %629 = vmatpush.msrb.mxu2 %v401_v42  ;;  %608 = vmatpush.msrb.mxu1 %v407_v43 }
  0xa3   : > { %589 = vmatpush.msrb.mxu0 %v399_v45 }
  0xa4   : > { %630 = vmatpush.msrb.mxu2 %v394_v44  ;;  %609 = vmatpush.msrb.mxu1 %v400_v46 }
  0xa5   : > { %590 = vmatpush.msrb.mxu0 %v392_v48 }
  0xa6   : > { %631 = vmatpush.msrb.mxu2 %v387_v47  ;;  %610 = vmatpush.msrb.mxu1 %v393_v49 }
  0xa7   : > { %591 = vmatpush.msrb.mxu0 %v385_v52 }
  0xa8   : > { %632 = vmatpush.msrb.mxu2 %v380_v51  ;;  %611 = vmatpush.msrb.mxu1 %v386_v54 }
  0xa9   : > { %733 = vmatmul.msk.f32.vlgmr.msrb.gmra.mxu2 %vm471_vm1, %v1104_v22  ;;  %592 = vmatpush.msrb.mxu0 %v378_v55 }
  0xaa   : > { %612 = vmatpush.msrb.mxu1 %v379_v56  ;;  %729 = vmatmul.msk.f32.vlgmr.msrb.gmra.mxu0 %vm471_vm1, %v1104_v22 }
  0xab   : > { %731 = vmatmul.msk.f32.vlgmr.msrb.gmra.mxu1 %vm471_vm1, %v1104_v22 }
 0x111   : > { %v469_v57 = vpop.permute.xlu0 %468 }
 0x112   : > { %v554_v58 = vpop.f32.mrf.mxu2 }
 0x113   : > { %v555_v59 = vadd.f32 %v554_v58, %v469_v57 }
 0x115   : > { %v639_v62 = vmax.f32 %v555_v59, 0.0 }
 0x116   : > { %v514_v0 = vpop.f32.mrf.mxu0 }
 0x117   : > { %646 = vst [vmem:[%s371_s11 + $0x10] sm:$0xff] %v639_v62  ;;  %v515_v1 = vadd.f32 %v514_v0, %v469_v57 }
 0x119   : > { %v637_v2 = vmax.f32 %v515_v1, 0.0 }
 0x11b   : > { %644 = vst [vmem:[%s371_s11] sm:$0xff] %v637_v2 }
 0x11c   : > { %v534_v60 = vpop.f32.mrf.mxu1 }
 0x11d   : > { %v535_v61 = vadd.f32 %v534_v60, %v469_v57 }
 0x11e   : > { %v574_v3 = vpop.f32.mrf.mxu3 }
 0x11f   : > { %v638_v63 = vmax.f32 %v535_v61, 0.0  ;;  %v575_v4 = vadd.f32 %v574_v3, %v469_v57 }
 0x121   : > { %645 = vst [vmem:[%s371_s11 + $0x8] sm:$0xff] %v638_v63  ;;  %v640_v6 = vmax.f32 %v575_v4, 0.0 }
 0x123   : > { %647 = vst [vmem:[%s371_s11 + $0x18] sm:$0xff] %v640_v6 }
 0x127   : > { %v594_v5 = vpop.f32.mrf.mxu0 }
 0x128   : > { %v595_v7 = vadd.f32 %v594_v5, %v469_v57  ;;  %v614_v8 = vpop.f32.mrf.mxu1 }
 0x129   : > { %v615_v9 = vadd.f32 %v614_v8, %v469_v57 }
 0x12a   : > { %v641_v10 = vmax.f32 %v595_v7, 0.0 }
 0x12b   : > { %v642_v11 = vmax.f32 %v615_v9, 0.0 }
 0x12c   : > { %v634_v12 = vpop.f32.mrf.mxu2  ;;  %648 = vst [vmem:[%s371_s11 + $0x20] sm:$0xff] %v641_v10 }
 0x12d   : > { %v635_v13 = vadd.f32 %v634_v12, %v469_v57  ;;  %649 = vst [vmem:[%s371_s11 + $0x28] sm:$0xff] %v642_v11 }
 0x12f   : > { %v643_v14 = vmax.f32 %v635_v13, 0.0 }
 0x131   : > { %650 = vst [vmem:[%s371_s11 + $0x30] sm:$0xff] %v643_v14 }
 0x132 PF: > { %p10_p9 = scmp.ge.s32.totalorder %s827_s16, 4   ;;  %s1174_s12 = smov %s783_s13 }
 0x133   : > { %s1175_s13 = smov %s836_s19  ;;  %s1176_s14 = smov %s827_s16 }
 0x134   :  { %12 = sbr.rel (!%p10_p9) target bundleno = 2 (0x2), region = 90 }

</bundles_post_ra>
